<compile_context>
chip_gen: v5e
topology: v5e:2x2
jax: 0.10.0
libtpu: 0.0.40
codegen_flags: <defaults>
</compile_context>

<pallas_src>
import jax
import jax.numpy as jnp
import numpy as np
from jax import lax
from jax.experimental import pallas as pl
from jax.experimental.pallas import tpu as pltpu


# ----------------------------------------------------------------------------
# Helpers
# ----------------------------------------------------------------------------
def _full_spec(shape):
    """BlockSpec covering the whole array as one VMEM block (grid=(1,))."""
    nd = len(shape)
    return pl.BlockSpec(tuple(shape), lambda i, nd=nd: (0,) * nd)


# ----------------------------------------------------------------------------
# Pallas kernels
# ----------------------------------------------------------------------------
def _conv_pool_relu_kernel(p_ref, w_ref, b_ref, o_ref):
    """Fused VALID conv (as patch matmul) + 2x2 maxpool + bias + relu.

    p_ref: (4, M, K)  im2col patches, one slab per 2x2 pooling-window position
                      (same pooled output grid for all four slabs).
    w_ref: (K, Cout)  conv weight, HWIO reshaped to (kh*kw*Cin, Cout).
    b_ref: (1, Cout)
    o_ref: (M, Cout)  pooled activations, rows ordered (n, h_pooled, w_pooled).

    pool(relu(conv + b)) == relu(max_v(patches_v @ W) + b)  (relu monotone,
    shared bias), so we max-reduce the four matmul results and apply bias/relu
    once — everything stays in VMEM / vregs.
    """
    w = w_ref[...]
    s = jnp.dot(p_ref[0], w, preferred_element_type=jnp.float32)
    for v in range(1, 4):
        s = jnp.maximum(s, jnp.dot(p_ref[v], w,
                                   preferred_element_type=jnp.float32))
    o_ref[...] = jnp.maximum(s + b_ref[...], 0.0)


def _mlp5_kernel(x_ref, w1, b1, w2, b2, w3, b3, w4, b4, w5, b5, o_ref):
    """Fused fc1..fc5: five chained (matmul + bias + relu); intermediates
    live in vregs/VMEM, never HBM."""
    def layer(h, w_ref, b_ref):
        acc = jnp.dot(h, w_ref[...], preferred_element_type=jnp.float32)
        return jnp.maximum(acc + b_ref[...], 0.0)

    h = layer(x_ref[...], w1, b1)
    h = layer(h, w2, b2)
    h = layer(h, w3, b3)
    h = layer(h, w4, b4)
    o_ref[...] = layer(h, w5, b5)


# ----------------------------------------------------------------------------
# pallas_call wrappers
# ----------------------------------------------------------------------------
def conv_pool_relu(patches, w, b):
    """patches: (4, M, K), w: (K, Cout), b: (Cout,) -> (M, Cout)."""
    V, M, K = patches.shape
    Kw, C = w.shape
    assert V == 4 and K == Kw
    flops = 2 * V * M * K * C + 5 * M * C
    bytes_acc = 4 * (patches.size + w.size + C + M * C)
    return pl.pallas_call(
        _conv_pool_relu_kernel,
        out_shape=jax.ShapeDtypeStruct((M, C), jnp.float32),
        grid=(1,),
        in_specs=[
            _full_spec((V, M, K)),
            _full_spec((K, C)),
            _full_spec((1, C)),
        ],
        out_specs=_full_spec((M, C)),
        compiler_params=pltpu.CompilerParams(
            dimension_semantics=("arbitrary",)),
        cost_estimate=pl.CostEstimate(flops=flops, transcendentals=0,
                                      bytes_accessed=bytes_acc),
    )(patches, w, b.reshape(1, C))


def mlp5(x, layers):
    """x: (M, K0); layers: list of 5 (w, b). Returns (M, N_last)."""
    assert len(layers) == 5
    M = x.shape[0]
    n_out = layers[-1][0].shape[1]
    args = [x]
    in_specs = [_full_spec(x.shape)]
    flops = 0
    bytes_acc = x.size + M * n_out
    for w, b in layers:
        b2 = b.reshape(1, -1)
        args += [w, b2]
        in_specs += [_full_spec(w.shape), _full_spec(b2.shape)]
        flops += 2 * M * w.shape[0] * w.shape[1] + 2 * M * w.shape[1]
        bytes_acc += w.size + b2.size
    return pl.pallas_call(
        _mlp5_kernel,
        out_shape=jax.ShapeDtypeStruct((M, n_out), jnp.float32),
        grid=(1,),
        in_specs=in_specs,
        out_specs=_full_spec((M, n_out)),
        compiler_params=pltpu.CompilerParams(
            dimension_semantics=("arbitrary",)),
        cost_estimate=pl.CostEstimate(flops=flops, transcendentals=0,
                                      bytes_accessed=4 * bytes_acc),
    )(*args)


# ----------------------------------------------------------------------------
# Glue: build per-pooling-window im2col slabs (tiny; stays in XLA)
# ----------------------------------------------------------------------------
def _pooled_im2col_views(x, k=5, pool=2):
    """x: (N,H,W,C) NHWC -> ((4, N*Hp*Wp, k*k*C), (N, Hp, Wp)).

    Slab v=(di,dj) holds the im2col patches of exactly the conv-output
    positions (2i+di, 2j+dj) that feed pooled output (i, j); feature order
    is (kh, kw, cin), matching HWIO weights reshaped to (k*k*Cin, Cout).
    """
    N, H, W, C = x.shape
    Ho, Wo = H - k + 1, W - k + 1
    Hp, Wp = Ho // pool, Wo // pool
    views = []
    for di in range(pool):
        for dj in range(pool):
            taps = []
            for kh in range(k):
                for kw in range(k):
                    r0, c0 = di + kh, dj + kw
                    taps.append(x[:, r0:r0 + pool * Hp:pool,
                                  c0:c0 + pool * Wp:pool, :])
            t = jnp.stack(taps, axis=3)                  # (N, Hp, Wp, k*k, C)
            views.append(t.reshape(N * Hp * Wp, k * k * C))
    return jnp.stack(views, axis=0), (N, Hp, Wp)


# ----------------------------------------------------------------------------
# Full network forward (3 pallas_calls)
# ----------------------------------------------------------------------------
def forward(x_nchw, p):
    x = jnp.transpose(x_nchw, (0, 2, 3, 1)).astype(jnp.float32)   # NCHW -> NHWC

    # Stage 1: conv1(5x5) + relu + maxpool2x2  -> (N, 14, 14, 6)
    v1, (N, hp1, wp1) = _pooled_im2col_views(x, 5, 2)
    y1 = conv_pool_relu(v1, p['conv1_w'].reshape(5 * 5 * 3, 6), p['conv1_b'])
    y1 = y1.reshape(N, hp1, wp1, 6)

    # Stage 2: conv2(5x5) + relu + maxpool2x2  -> (N, 5, 5, 16)
    v2, (_, hp2, wp2) = _pooled_im2col_views(y1, 5, 2)
    y2 = conv_pool_relu(v2, p['conv2_w'].reshape(5 * 5 * 6, 16), p['conv2_b'])

    # NHWC flatten; fc1_w is stored pre-permuted for (h, w, c) order, so no
    # NHWC->NCHW transpose is needed here.
    flat = y2.reshape(N, hp2 * wp2 * 16)

    # Stage 3: fc1..fc5 fused (relu after every layer, incl. the last).
    return mlp5(flat, [(p['fc1_w'], p['fc1_b']),
                       (p['fc2_w'], p['fc2_b']),
                       (p['fc3_w'], p['fc3_b']),
                       (p['fc4_w'], p['fc4_b']),
                       (p['fc5_w'], p['fc5_b'])])


# ----------------------------------------------------------------------------
# Pure-JAX reference (correctness check only)
# ----------------------------------------------------------------------------
def reference_forward(x_nchw, p):
    relu = lambda v: jnp.maximum(v, 0.0)
    hp = lax.Precision.HIGHEST
    x = jnp.transpose(x_nchw, (0, 2, 3, 1)).astype(jnp.float32)

    def conv(inp, w, b):
        y = lax.conv_general_dilated(
            inp, w, (1, 1), 'VALID',
            dimension_numbers=('NHWC', 'HWIO', 'NHWC'), precision=hp)
        return y + b

    def pool(inp):
        return lax.reduce_window(inp, -jnp.inf, lax.max,
                                 (1, 2, 2, 1), (1, 2, 2, 1), 'VALID')

    y = pool(relu(conv(x, p['conv1_w'], p['conv1_b'])))
    y = pool(relu(conv(y, p['conv2_w'], p['conv2_b'])))
    flat = y.reshape(y.shape[0], -1)                    # NHWC flatten order
    h = relu(jnp.dot(flat, p['fc1_w'], precision=hp) + p['fc1_b'])
    h = relu(jnp.dot(h, p['fc2_w'], precision=hp) + p['fc2_b'])
    h = relu(jnp.dot(h, p['fc3_w'], precision=hp) + p['fc3_b'])
    h = relu(jnp.dot(h, p['fc4_w'], precision=hp) + p['fc4_b'])
    return relu(jnp.dot(h, p['fc5_w'], precision=hp) + p['fc5_b'])


# ----------------------------------------------------------------------------
# Deterministic synthetic parameters (He-style scaling).
# Conv weights are HWIO; fc weights are (in, out) with fc1's input dimension
# pre-permuted to the NHWC flatten order (functionally the same parameter
# space as PyTorch's (c, h, w) flatten — used consistently here and in the
# reference).
# ----------------------------------------------------------------------------
def init_params(key):
    keys = iter(jax.random.split(key, 20))

    def w_conv(kh, kw, cin, cout):
        return (jax.random.normal(next(keys), (kh, kw, cin, cout), jnp.float32)
                * (2.0 / (kh * kw * cin)) ** 0.5)

    def w_mat(cin, cout):
        return (jax.random.normal(next(keys), (cin, cout), jnp.float32)
                * (2.0 / cin) ** 0.5)

    def bias(c):
        return jax.random.normal(next(keys), (c,), jnp.float32) * 0.01

    p = {}
    p['conv1_w'] = w_conv(5, 5, 3, 6);    p['conv1_b'] = bias(6)
    p['conv2_w'] = w_conv(5, 5, 6, 16);   p['conv2_b'] = bias(16)
    p['fc1_w'] = w_mat(16 * 5 * 5, 120);  p['fc1_b'] = bias(120)
    p['fc2_w'] = w_mat(120, 84);          p['fc2_b'] = bias(84)
    p['fc3_w'] = w_mat(84, 42);           p['fc3_b'] = bias(42)
    p['fc4_w'] = w_mat(42, 21);           p['fc4_b'] = bias(21)
    p['fc5_w'] = w_mat(21, 10);           p['fc5_b'] = bias(10)
    return p


if __name__ == "__main__":
    key = jax.random.PRNGKey(0)
    pkey, xkey = jax.random.split(key)
    params = init_params(pkey)

    # Input shape dictated by the module: fc1 expects 16*5*5, i.e. 32x32
    # spatial with 3 channels after two (conv5 VALID + pool2) stages.
    x = jax.random.normal(xkey, (2, 3, 32, 32), jnp.float32)

    fwd = jax.jit(forward)
    out = jax.block_until_ready(fwd(x, params))
    assert out.shape == (2, 10)
    assert bool(jnp.all(jnp.isfinite(out)))
    assert bool(jnp.all(out >= 0.0))          # final relu

    ref = reference_forward(x, params)
    np.testing.assert_allclose(np.asarray(out), np.asarray(ref),
                               rtol=1e-3, atol=1e-3)

    print("KERNEL_OK")
</pallas_src>

<mosaic_0001>
module attributes {stable_mosaic.version = 11 : i64} {
  func.func @_conv_pool_relu_kernel(%arg0: i32, %arg1: memref<4x392x75xf32, #tpu.memory_space<vmem>>, %arg2: memref<75x6xf32, #tpu.memory_space<vmem>>, %arg3: memref<1x6xf32, #tpu.memory_space<vmem>>, %arg4: memref<392x6xf32, #tpu.memory_space<vmem>>) attributes {dimension_semantics = [#tpu.dimension_semantics<arbitrary>], iteration_bounds = array<i64: 1>, scalar_prefetch = 0 : i64, scratch_operands = 0 : i64, tpu.core_type = #tpu.core_type<tc>, window_params = [{pipeline_mode = #tpu.pipeline_mode<synchronous>, transform_indices = @transform_0, window_bounds = array<i64: 4, 392, 75>}, {pipeline_mode = #tpu.pipeline_mode<synchronous>, transform_indices = @transform_1, window_bounds = array<i64: 75, 6>}, {pipeline_mode = #tpu.pipeline_mode<synchronous>, transform_indices = @transform_2, window_bounds = array<i64: 1, 6>}, {pipeline_mode = #tpu.pipeline_mode<synchronous>, transform_indices = @transform_3, window_bounds = array<i64: 392, 6>}]} {
    %c0 = arith.constant 0 : index
    %c0_0 = arith.constant 0 : index
    %0 = vector.load %arg2[%c0, %c0_0] : memref<75x6xf32, #tpu.memory_space<vmem>>, vector<75x6xf32>
    %c0_1 = arith.constant 0 : index
    %c0_2 = arith.constant 0 : index
    %c0_3 = arith.constant 0 : index
    %1 = vector.load %arg1[%c0_1, %c0_2, %c0_3] : memref<4x392x75xf32, #tpu.memory_space<vmem>>, vector<1x392x75xf32>
    %2 = vector.shape_cast %1 : vector<1x392x75xf32> to vector<392x75xf32>
    %cst = arith.constant dense<0.000000e+00> : vector<392x6xf32>
    %3 = tpu.matmul %2, %0, %cst {dimension_numbers = #tpu.dot_dimension_numbers<[1], [0], [0], [1], [0, 0, 1, 1], [], []>} : vector<392x75xf32>, vector<75x6xf32>, vector<392x6xf32> -> vector<392x6xf32>
    %c1 = arith.constant 1 : index
    %c0_4 = arith.constant 0 : index
    %c0_5 = arith.constant 0 : index
    %4 = vector.load %arg1[%c1, %c0_4, %c0_5] : memref<4x392x75xf32, #tpu.memory_space<vmem>>, vector<1x392x75xf32>
    %5 = vector.shape_cast %4 : vector<1x392x75xf32> to vector<392x75xf32>
    %cst_6 = arith.constant dense<0.000000e+00> : vector<392x6xf32>
    %6 = tpu.matmul %5, %0, %cst_6 {dimension_numbers = #tpu.dot_dimension_numbers<[1], [0], [0], [1], [0, 0, 1, 1], [], []>} : vector<392x75xf32>, vector<75x6xf32>, vector<392x6xf32> -> vector<392x6xf32>
    %7 = arith.maximumf %3, %6 : vector<392x6xf32>
    %c2 = arith.constant 2 : index
    %c0_7 = arith.constant 0 : index
    %c0_8 = arith.constant 0 : index
    %8 = vector.load %arg1[%c2, %c0_7, %c0_8] : memref<4x392x75xf32, #tpu.memory_space<vmem>>, vector<1x392x75xf32>
    %9 = vector.shape_cast %8 : vector<1x392x75xf32> to vector<392x75xf32>
    %cst_9 = arith.constant dense<0.000000e+00> : vector<392x6xf32>
    %10 = tpu.matmul %9, %0, %cst_9 {dimension_numbers = #tpu.dot_dimension_numbers<[1], [0], [0], [1], [0, 0, 1, 1], [], []>} : vector<392x75xf32>, vector<75x6xf32>, vector<392x6xf32> -> vector<392x6xf32>
    %11 = arith.maximumf %7, %10 : vector<392x6xf32>
    %c3 = arith.constant 3 : index
    %c0_10 = arith.constant 0 : index
    %c0_11 = arith.constant 0 : index
    %12 = vector.load %arg1[%c3, %c0_10, %c0_11] : memref<4x392x75xf32, #tpu.memory_space<vmem>>, vector<1x392x75xf32>
    %13 = vector.shape_cast %12 : vector<1x392x75xf32> to vector<392x75xf32>
    %cst_12 = arith.constant dense<0.000000e+00> : vector<392x6xf32>
    %14 = tpu.matmul %13, %0, %cst_12 {dimension_numbers = #tpu.dot_dimension_numbers<[1], [0], [0], [1], [0, 0, 1, 1], [], []>} : vector<392x75xf32>, vector<75x6xf32>, vector<392x6xf32> -> vector<392x6xf32>
    %15 = arith.maximumf %11, %14 : vector<392x6xf32>
    %c0_13 = arith.constant 0 : index
    %c0_14 = arith.constant 0 : index
    %16 = vector.load %arg3[%c0_13, %c0_14] : memref<1x6xf32, #tpu.memory_space<vmem>>, vector<1x6xf32>
    %17 = vector.broadcast %16 : vector<1x6xf32> to vector<392x6xf32>
    %18 = arith.addf %15, %17 : vector<392x6xf32>
    %cst_15 = arith.constant 0.000000e+00 : f32
    %19 = vector.broadcast %cst_15 : f32 to vector<392x6xf32>
    %20 = arith.maximumf %18, %19 : vector<392x6xf32>
    %c0_16 = arith.constant 0 : index
    %c0_17 = arith.constant 0 : index
    %21 = vector.load %arg4[%c0_16, %c0_17] : memref<392x6xf32, #tpu.memory_space<vmem>>, vector<392x6xf32>
    tpu.vector_store %arg4[%c0_16, %c0_17], %20 {strides = array<i32>} : memref<392x6xf32, #tpu.memory_space<vmem>>, vector<392x6xf32>,
    return
  }
  func.func @transform_0(%arg0: i32) -> (i32, i32, i32) {
    %c0_i32 = arith.constant 0 : i32
    %c0_i32_0 = arith.constant 0 : i32
    %c0_i32_1 = arith.constant 0 : i32
    %c0_i32_2 = arith.constant 0 : i32
    return %c0_i32, %c0_i32_0, %c0_i32_1 : i32, i32, i32
  }
  func.func @transform_1(%arg0: i32) -> (i32, i32) {
    %c0_i32 = arith.constant 0 : i32
    %c0_i32_0 = arith.constant 0 : i32
    %c0_i32_1 = arith.constant 0 : i32
    return %c0_i32, %c0_i32_0 : i32, i32
  }
  func.func @transform_2(%arg0: i32) -> (i32, i32) {
    %c0_i32 = arith.constant 0 : i32
    %c0_i32_0 = arith.constant 0 : i32
    %c0_i32_1 = arith.constant 0 : i32
    return %c0_i32, %c0_i32_0 : i32, i32
  }
  func.func @transform_3(%arg0: i32) -> (i32, i32) {
    %c0_i32 = arith.constant 0 : i32
    %c0_i32_0 = arith.constant 0 : i32
    %c0_i32_1 = arith.constant 0 : i32
    return %c0_i32, %c0_i32_0 : i32, i32
  }
}

module attributes {stable_mosaic.version = 11 : i64} {
  func.func @_conv_pool_relu_kernel(%arg0: i32, %arg1: memref<4x50x150xf32, #tpu.memory_space<vmem>>, %arg2: memref<150x16xf32, #tpu.memory_space<vmem>>, %arg3: memref<1x16xf32, #tpu.memory_space<vmem>>, %arg4: memref<50x16xf32, #tpu.memory_space<vmem>>) attributes {dimension_semantics = [#tpu.dimension_semantics<arbitrary>], iteration_bounds = array<i64: 1>, scalar_prefetch = 0 : i64, scratch_operands = 0 : i64, tpu.core_type = #tpu.core_type<tc>, window_params = [{pipeline_mode = #tpu.pipeline_mode<synchronous>, transform_indices = @transform_0, window_bounds = array<i64: 4, 50, 150>}, {pipeline_mode = #tpu.pipeline_mode<synchronous>, transform_indices = @transform_1, window_bounds = array<i64: 150, 16>}, {pipeline_mode = #tpu.pipeline_mode<synchronous>, transform_indices = @transform_2, window_bounds = array<i64: 1, 16>}, {pipeline_mode = #tpu.pipeline_mode<synchronous>, transform_indices = @transform_3, window_bounds = array<i64: 50, 16>}]} {
    %c0 = arith.constant 0 : index
    %c0_0 = arith.constant 0 : index
    %0 = vector.load %arg2[%c0, %c0_0] : memref<150x16xf32, #tpu.memory_space<vmem>>, vector<150x16xf32>
    %c0_1 = arith.constant 0 : index
    %c0_2 = arith.constant 0 : index
    %c0_3 = arith.constant 0 : index
    %1 = vector.load %arg1[%c0_1, %c0_2, %c0_3] : memref<4x50x150xf32, #tpu.memory_space<vmem>>, vector<1x50x150xf32>
    %2 = vector.shape_cast %1 : vector<1x50x150xf32> to vector<50x150xf32>
    %cst = arith.constant dense<0.000000e+00> : vector<50x16xf32>
    %3 = tpu.matmul %2, %0, %cst {dimension_numbers = #tpu.dot_dimension_numbers<[1], [0], [0], [1], [0, 0, 1, 1], [], []>} : vector<50x150xf32>, vector<150x16xf32>, vector<50x16xf32> -> vector<50x16xf32>
    %c1 = arith.constant 1 : index
    %c0_4 = arith.constant 0 : index
    %c0_5 = arith.constant 0 : index
    %4 = vector.load %arg1[%c1, %c0_4, %c0_5] : memref<4x50x150xf32, #tpu.memory_space<vmem>>, vector<1x50x150xf32>
    %5 = vector.shape_cast %4 : vector<1x50x150xf32> to vector<50x150xf32>
    %cst_6 = arith.constant dense<0.000000e+00> : vector<50x16xf32>
    %6 = tpu.matmul %5, %0, %cst_6 {dimension_numbers = #tpu.dot_dimension_numbers<[1], [0], [0], [1], [0, 0, 1, 1], [], []>} : vector<50x150xf32>, vector<150x16xf32>, vector<50x16xf32> -> vector<50x16xf32>
    %7 = arith.maximumf %3, %6 : vector<50x16xf32>
    %c2 = arith.constant 2 : index
    %c0_7 = arith.constant 0 : index
    %c0_8 = arith.constant 0 : index
    %8 = vector.load %arg1[%c2, %c0_7, %c0_8] : memref<4x50x150xf32, #tpu.memory_space<vmem>>, vector<1x50x150xf32>
    %9 = vector.shape_cast %8 : vector<1x50x150xf32> to vector<50x150xf32>
    %cst_9 = arith.constant dense<0.000000e+00> : vector<50x16xf32>
    %10 = tpu.matmul %9, %0, %cst_9 {dimension_numbers = #tpu.dot_dimension_numbers<[1], [0], [0], [1], [0, 0, 1, 1], [], []>} : vector<50x150xf32>, vector<150x16xf32>, vector<50x16xf32> -> vector<50x16xf32>
    %11 = arith.maximumf %7, %10 : vector<50x16xf32>
    %c3 = arith.constant 3 : index
    %c0_10 = arith.constant 0 : index
    %c0_11 = arith.constant 0 : index
    %12 = vector.load %arg1[%c3, %c0_10, %c0_11] : memref<4x50x150xf32, #tpu.memory_space<vmem>>, vector<1x50x150xf32>
    %13 = vector.shape_cast %12 : vector<1x50x150xf32> to vector<50x150xf32>
    %cst_12 = arith.constant dense<0.000000e+00> : vector<50x16xf32>
    %14 = tpu.matmul %13, %0, %cst_12 {dimension_numbers = #tpu.dot_dimension_numbers<[1], [0], [0], [1], [0, 0, 1, 1], [], []>} : vector<50x150xf32>, vector<150x16xf32>, vector<50x16xf32> -> vector<50x16xf32>
    %15 = arith.maximumf %11, %14 : vector<50x16xf32>
    %c0_13 = arith.constant 0 : index
    %c0_14 = arith.constant 0 : index
    %16 = vector.load %arg3[%c0_13, %c0_14] : memref<1x16xf32, #tpu.memory_space<vmem>>, vector<1x16xf32>
    %17 = vector.broadcast %16 : vector<1x16xf32> to vector<50x16xf32>
    %18 = arith.addf %15, %17 : vector<50x16xf32>
    %cst_15 = arith.constant 0.000000e+00 : f32
    %19 = vector.broadcast %cst_15 : f32 to vector<50x16xf32>
    %20 = arith.maximumf %18, %19 : vector<50x16xf32>
    %c0_16 = arith.constant 0 : index
    %c0_17 = arith.constant 0 : index
    %21 = vector.load %arg4[%c0_16, %c0_17] : memref<50x16xf32, #tpu.memory_space<vmem>>, vector<50x16xf32>
    tpu.vector_store %arg4[%c0_16, %c0_17], %20 {strides = array<i32>} : memref<50x16xf32, #tpu.memory_space<vmem>>, vector<50x16xf32>,
    return
  }
  func.func @transform_0(%arg0: i32) -> (i32, i32, i32) {
    %c0_i32 = arith.constant 0 : i32
    %c0_i32_0 = arith.constant 0 : i32
    %c0_i32_1 = arith.constant 0 : i32
    %c0_i32_2 = arith.constant 0 : i32
    return %c0_i32, %c0_i32_0, %c0_i32_1 : i32, i32, i32
  }
  func.func @transform_1(%arg0: i32) -> (i32, i32) {
    %c0_i32 = arith.constant 0 : i32
    %c0_i32_0 = arith.constant 0 : i32
    %c0_i32_1 = arith.constant 0 : i32
    return %c0_i32, %c0_i32_0 : i32, i32
  }
  func.func @transform_2(%arg0: i32) -> (i32, i32) {
    %c0_i32 = arith.constant 0 : i32
    %c0_i32_0 = arith.constant 0 : i32
    %c0_i32_1 = arith.constant 0 : i32
    return %c0_i32, %c0_i32_0 : i32, i32
  }
  func.func @transform_3(%arg0: i32) -> (i32, i32) {
    %c0_i32 = arith.constant 0 : i32
    %c0_i32_0 = arith.constant 0 : i32
    %c0_i32_1 = arith.constant 0 : i32
    return %c0_i32, %c0_i32_0 : i32, i32
  }
}

module attributes {stable_mosaic.version = 11 : i64} {
  func.func @_mlp5_kernel(%arg0: i32, %arg1: memref<2x400xf32, #tpu.memory_space<vmem>>, %arg2: memref<400x120xf32, #tpu.memory_space<vmem>>, %arg3: memref<1x120xf32, #tpu.memory_space<vmem>>, %arg4: memref<120x84xf32, #tpu.memory_space<vmem>>, %arg5: memref<1x84xf32, #tpu.memory_space<vmem>>, %arg6: memref<84x42xf32, #tpu.memory_space<vmem>>, %arg7: memref<1x42xf32, #tpu.memory_space<vmem>>, %arg8: memref<42x21xf32, #tpu.memory_space<vmem>>, %arg9: memref<1x21xf32, #tpu.memory_space<vmem>>, %arg10: memref<21x10xf32, #tpu.memory_space<vmem>>, %arg11: memref<1x10xf32, #tpu.memory_space<vmem>>, %arg12: memref<2x10xf32, #tpu.memory_space<vmem>>) attributes {dimension_semantics = [#tpu.dimension_semantics<arbitrary>], iteration_bounds = array<i64: 1>, scalar_prefetch = 0 : i64, scratch_operands = 0 : i64, tpu.core_type = #tpu.core_type<tc>, window_params = [{pipeline_mode = #tpu.pipeline_mode<synchronous>, transform_indices = @transform_0, window_bounds = array<i64: 2, 400>}, {pipeline_mode = #tpu.pipeline_mode<synchronous>, transform_indices = @transform_1, window_bounds = array<i64: 400, 120>}, {pipeline_mode = #tpu.pipeline_mode<synchronous>, transform_indices = @transform_2, window_bounds = array<i64: 1, 120>}, {pipeline_mode = #tpu.pipeline_mode<synchronous>, transform_indices = @transform_3, window_bounds = array<i64: 120, 84>}, {pipeline_mode = #tpu.pipeline_mode<synchronous>, transform_indices = @transform_4, window_bounds = array<i64: 1, 84>}, {pipeline_mode = #tpu.pipeline_mode<synchronous>, transform_indices = @transform_5, window_bounds = array<i64: 84, 42>}, {pipeline_mode = #tpu.pipeline_mode<synchronous>, transform_indices = @transform_6, window_bounds = array<i64: 1, 42>}, {pipeline_mode = #tpu.pipeline_mode<synchronous>, transform_indices = @transform_7, window_bounds = array<i64: 42, 21>}, {pipeline_mode = #tpu.pipeline_mode<synchronous>, transform_indices = @transform_8, window_bounds = array<i64: 1, 21>}, {pipeline_mode = #tpu.pipeline_mode<synchronous>, transform_indices = @transform_9, window_bounds = array<i64: 21, 10>}, {pipeline_mode = #tpu.pipeline_mode<synchronous>, transform_indices = @transform_10, window_bounds = array<i64: 1, 10>}, {pipeline_mode = #tpu.pipeline_mode<synchronous>, transform_indices = @transform_11, window_bounds = array<i64: 2, 10>}]} {
    %c0 = arith.constant 0 : index
    %c0_0 = arith.constant 0 : index
    %0 = vector.load %arg1[%c0, %c0_0] : memref<2x400xf32, #tpu.memory_space<vmem>>, vector<2x400xf32>
    %c0_1 = arith.constant 0 : index
    %c0_2 = arith.constant 0 : index
    %1 = vector.load %arg2[%c0_1, %c0_2] : memref<400x120xf32, #tpu.memory_space<vmem>>, vector<400x120xf32>
    %cst = arith.constant dense<0.000000e+00> : vector<2x120xf32>
    %2 = tpu.matmul %0, %1, %cst {dimension_numbers = #tpu.dot_dimension_numbers<[1], [0], [0], [1], [0, 0, 1, 1], [], []>} : vector<2x400xf32>, vector<400x120xf32>, vector<2x120xf32> -> vector<2x120xf32>
    %c0_3 = arith.constant 0 : index
    %c0_4 = arith.constant 0 : index
    %3 = vector.load %arg3[%c0_3, %c0_4] : memref<1x120xf32, #tpu.memory_space<vmem>>, vector<1x120xf32>
    %4 = vector.broadcast %3 : vector<1x120xf32> to vector<2x120xf32>
    %5 = arith.addf %2, %4 : vector<2x120xf32>
    %cst_5 = arith.constant 0.000000e+00 : f32
    %6 = vector.broadcast %cst_5 : f32 to vector<2x120xf32>
    %7 = arith.maximumf %5, %6 : vector<2x120xf32>
    %c0_6 = arith.constant 0 : index
    %c0_7 = arith.constant 0 : index
    %8 = vector.load %arg4[%c0_6, %c0_7] : memref<120x84xf32, #tpu.memory_space<vmem>>, vector<120x84xf32>
    %cst_8 = arith.constant dense<0.000000e+00> : vector<2x84xf32>
    %9 = tpu.matmul %7, %8, %cst_8 {dimension_numbers = #tpu.dot_dimension_numbers<[1], [0], [0], [1], [0, 0, 1, 1], [], []>} : vector<2x120xf32>, vector<120x84xf32>, vector<2x84xf32> -> vector<2x84xf32>
    %c0_9 = arith.constant 0 : index
    %c0_10 = arith.constant 0 : index
    %10 = vector.load %arg5[%c0_9, %c0_10] : memref<1x84xf32, #tpu.memory_space<vmem>>, vector<1x84xf32>
    %11 = vector.broadcast %10 : vector<1x84xf32> to vector<2x84xf32>
    %12 = arith.addf %9, %11 : vector<2x84xf32>
    %cst_11 = arith.constant 0.000000e+00 : f32
    %13 = vector.broadcast %cst_11 : f32 to vector<2x84xf32>
    %14 = arith.maximumf %12, %13 : vector<2x84xf32>
    %c0_12 = arith.constant 0 : index
    %c0_13 = arith.constant 0 : index
    %15 = vector.load %arg6[%c0_12, %c0_13] : memref<84x42xf32, #tpu.memory_space<vmem>>, vector<84x42xf32>
    %cst_14 = arith.constant dense<0.000000e+00> : vector<2x42xf32>
    %16 = tpu.matmul %14, %15, %cst_14 {dimension_numbers = #tpu.dot_dimension_numbers<[1], [0], [0], [1], [0, 0, 1, 1], [], []>} : vector<2x84xf32>, vector<84x42xf32>, vector<2x42xf32> -> vector<2x42xf32>
    %c0_15 = arith.constant 0 : index
    %c0_16 = arith.constant 0 : index
    %17 = vector.load %arg7[%c0_15, %c0_16] : memref<1x42xf32, #tpu.memory_space<vmem>>, vector<1x42xf32>
    %18 = vector.broadcast %17 : vector<1x42xf32> to vector<2x42xf32>
    %19 = arith.addf %16, %18 : vector<2x42xf32>
    %cst_17 = arith.constant 0.000000e+00 : f32
    %20 = vector.broadcast %cst_17 : f32 to vector<2x42xf32>
    %21 = arith.maximumf %19, %20 : vector<2x42xf32>
    %c0_18 = arith.constant 0 : index
    %c0_19 = arith.constant 0 : index
    %22 = vector.load %arg8[%c0_18, %c0_19] : memref<42x21xf32, #tpu.memory_space<vmem>>, vector<42x21xf32>
    %cst_20 = arith.constant dense<0.000000e+00> : vector<2x21xf32>
    %23 = tpu.matmul %21, %22, %cst_20 {dimension_numbers = #tpu.dot_dimension_numbers<[1], [0], [0], [1], [0, 0, 1, 1], [], []>} : vector<2x42xf32>, vector<42x21xf32>, vector<2x21xf32> -> vector<2x21xf32>
    %c0_21 = arith.constant 0 : index
    %c0_22 = arith.constant 0 : index
    %24 = vector.load %arg9[%c0_21, %c0_22] : memref<1x21xf32, #tpu.memory_space<vmem>>, vector<1x21xf32>
    %25 = vector.broadcast %24 : vector<1x21xf32> to vector<2x21xf32>
    %26 = arith.addf %23, %25 : vector<2x21xf32>
    %cst_23 = arith.constant 0.000000e+00 : f32
    %27 = vector.broadcast %cst_23 : f32 to vector<2x21xf32>
    %28 = arith.maximumf %26, %27 : vector<2x21xf32>
    %c0_24 = arith.constant 0 : index
    %c0_25 = arith.constant 0 : index
    %29 = vector.load %arg10[%c0_24, %c0_25] : memref<21x10xf32, #tpu.memory_space<vmem>>, vector<21x10xf32>
    %cst_26 = arith.constant dense<0.000000e+00> : vector<2x10xf32>
    %30 = tpu.matmul %28, %29, %cst_26 {dimension_numbers = #tpu.dot_dimension_numbers<[1], [0], [0], [1], [0, 0, 1, 1], [], []>} : vector<2x21xf32>, vector<21x10xf32>, vector<2x10xf32> -> vector<2x10xf32>
    %c0_27 = arith.constant 0 : index
    %c0_28 = arith.constant 0 : index
    %31 = vector.load %arg11[%c0_27, %c0_28] : memref<1x10xf32, #tpu.memory_space<vmem>>, vector<1x10xf32>
    %32 = vector.broadcast %31 : vector<1x10xf32> to vector<2x10xf32>
    %33 = arith.addf %30, %32 : vector<2x10xf32>
    %cst_29 = arith.constant 0.000000e+00 : f32
    %34 = vector.broadcast %cst_29 : f32 to vector<2x10xf32>
    %35 = arith.maximumf %33, %34 : vector<2x10xf32>
    %c0_30 = arith.constant 0 : index
    %c0_31 = arith.constant 0 : index
    %36 = vector.load %arg12[%c0_30, %c0_31] : memref<2x10xf32, #tpu.memory_space<vmem>>, vector<2x10xf32>
    tpu.vector_store %arg12[%c0_30, %c0_31], %35 {strides = array<i32>} : memref<2x10xf32, #tpu.memory_space<vmem>>, vector<2x10xf32>,
    return
  }
  func.func @transform_0(%arg0: i32) -> (i32, i32) {
    %c0_i32 = arith.constant 0 : i32
    %c0_i32_0 = arith.constant 0 : i32
    %c0_i32_1 = arith.constant 0 : i32
    return %c0_i32, %c0_i32_0 : i32, i32
  }
  func.func @transform_1(%arg0: i32) -> (i32, i32) {
    %c0_i32 = arith.constant 0 : i32
    %c0_i32_0 = arith.constant 0 : i32
    %c0_i32_1 = arith.constant 0 : i32
    return %c0_i32, %c0_i32_0 : i32, i32
  }
  func.func @transform_2(%arg0: i32) -> (i32, i32) {
    %c0_i32 = arith.constant 0 : i32
    %c0_i32_0 = arith.constant 0 : i32
    %c0_i32_1 = arith.constant 0 : i32
    return %c0_i32, %c0_i32_0 : i32, i32
  }
  func.func @transform_3(%arg0: i32) -> (i32, i32) {
    %c0_i32 = arith.constant 0 : i32
    %c0_i32_0 = arith.constant 0 : i32
    %c0_i32_1 = arith.constant 0 : i32
    return %c0_i32, %c0_i32_0 : i32, i32
  }
  func.func @transform_4(%arg0: i32) -> (i32, i32) {
    %c0_i32 = arith.constant 0 : i32
    %c0_i32_0 = arith.constant 0 : i32
    %c0_i32_1 = arith.constant 0 : i32
    return %c0_i32, %c0_i32_0 : i32, i32
  }
  func.func @transform_5(%arg0: i32) -> (i32, i32) {
    %c0_i32 = arith.constant 0 : i32
    %c0_i32_0 = arith.constant 0 : i32
    %c0_i32_1 = arith.constant 0 : i32
    return %c0_i32, %c0_i32_0 : i32, i32
  }
  func.func @transform_6(%arg0: i32) -> (i32, i32) {
    %c0_i32 = arith.constant 0 : i32
    %c0_i32_0 = arith.constant 0 : i32
    %c0_i32_1 = arith.constant 0 : i32
    return %c0_i32, %c0_i32_0 : i32, i32
  }
  func.func @transform_7(%arg0: i32) -> (i32, i32) {
    %c0_i32 = arith.constant 0 : i32
    %c0_i32_0 = arith.constant 0 : i32
    %c0_i32_1 = arith.constant 0 : i32
    return %c0_i32, %c0_i32_0 : i32, i32
  }
  func.func @transform_8(%arg0: i32) -> (i32, i32) {
    %c0_i32 = arith.constant 0 : i32
    %c0_i32_0 = arith.constant 0 : i32
    %c0_i32_1 = arith.constant 0 : i32
    return %c0_i32, %c0_i32_0 : i32, i32
  }
  func.func @transform_9(%arg0: i32) -> (i32, i32) {
    %c0_i32 = arith.constant 0 : i32
    %c0_i32_0 = arith.constant 0 : i32
    %c0_i32_1 = arith.constant 0 : i32
    return %c0_i32, %c0_i32_0 : i32, i32
  }
  func.func @transform_10(%arg0: i32) -> (i32, i32) {
    %c0_i32 = arith.constant 0 : i32
    %c0_i32_0 = arith.constant 0 : i32
    %c0_i32_1 = arith.constant 0 : i32
    return %c0_i32, %c0_i32_0 : i32, i32
  }
  func.func @transform_11(%arg0: i32) -> (i32, i32) {
    %c0_i32 = arith.constant 0 : i32
    %c0_i32_0 = arith.constant 0 : i32
    %c0_i32_1 = arith.constant 0 : i32
    return %c0_i32, %c0_i32_0 : i32, i32
  }
}

</mosaic_0001>

<bundles_post_ra>
// kernel: forward.3
= control target key start
LH: loop header
LB: loop body
LE: loop exit
PB: predicated region body
PF: predicated region fallthrough
CT: control target
= control target key end

     0   :  { %vm221_vm0 = vcmask 1042432   ;;  %vm73_vm1 = vcmask 613376   ;;  %vm1721_vm2 = vcmask 48128   ;;  %s3213_s1 = inlined_call_operand.vmem [shape: f32[75,6], index: 1, kind: input, shape index: {}]   ;;  %s3214_s0 = inlined_call_operand.vmem [shape: f32[4,392,75], index: 0, kind: input, shape index: {}]   ;;  %s3215_s2 = inlined_call_operand.vmem [shape: f32[1,6], index: 2, kind: input, shape index: {}]   ;;  %s3216_s3 = inlined_call_operand.vmem [shape: f32[392,6], index: 3, kind: output, shape index: {}]  }
   0x1   :  { %v23_v0 = vld [vmem:[%s3213_s1 + $0x48] sm:$0x7]  ;;  %v22_v1 = vld [vmem:[%s3213_s1 + $0x40] sm:$0xff]  ;;  %v21_v2 = vld [vmem:[%s3213_s1 + $0x38] sm:$0xff] }
   0x2   :  { %1973 = vmatpush.msk.msra.mxu2 %vm221_vm0, %v23_v0  ;;  %2072 = vmatpush.msk.msra.mxu3 %vm221_vm0, %v23_v0  ;;  %v20_v3 = vld [vmem:[%s3213_s1 + $0x30] sm:$0xff]  ;;  %v19_v4 = vld [vmem:[%s3213_s1 + $0x28] sm:$0xff]  ;;  %v18_v5 = vld [vmem:[%s3213_s1 + $0x20] sm:$0xff] }
   0x3   :  { %1775 = vmatpush.msk.msra.mxu0 %vm221_vm0, %v23_v0  ;;  %1874 = vmatpush.msk.msra.mxu1 %vm221_vm0, %v23_v0  ;;  %v17_v6 = vld [vmem:[%s3213_s1 + $0x18] sm:$0xff]  ;;  %v16_v7 = vld [vmem:[%s3213_s1 + $0x10] sm:$0xff]  ;;  %v15_v8 = vld [vmem:[%s3213_s1 + $0x8] sm:$0xff] }
   0x4   :  { %1003 = vmatpush.msra.mxu2 %v22_v1  ;;  %1413 = vmatpush.msra.mxu3 %v22_v1  ;;  %v14_v9 = vld [vmem:[%s3213_s1] sm:$0xff]  ;;  %v1924_v10 = vld [vmem:[%s3214_s0 + $0x310] sm:$0xff]  ;;  %v2023_v11 = vld [vmem:[%s3214_s0 + $0x498] sm:$0xff] }
   0x5   :  { %232 = vmatpush.msra.mxu0 %v22_v1  ;;  %593 = vmatpush.msra.mxu1 %v22_v1  ;;  %v24_v12 = vld [vmem:[%s3214_s0] sm:$0xff]  ;;  %v1825_v13 = vld [vmem:[%s3214_s0 + $0x188] sm:$0xff]  ;;  %v1925_v14 = vld [vmem:[%s3214_s0 + $0x318] sm:$0xff] }
   0x6   :  { %1004 = vmatpush.msra.mxu2 %v21_v2  ;;  %1414 = vmatpush.msra.mxu3 %v21_v2  ;;  %v2024_v15 = vld [vmem:[%s3214_s0 + $0x4a0] sm:$0xff]  ;;  %v25_v16 = vld [vmem:[%s3214_s0 + $0x8] sm:$0xff]  ;;  %v1826_v17 = vld [vmem:[%s3214_s0 + $0x190] sm:$0xff] }
   0x7   :  { %233 = vmatpush.msra.mxu0 %v21_v2  ;;  %594 = vmatpush.msra.mxu1 %v21_v2  ;;  %v1926_v18 = vld [vmem:[%s3214_s0 + $0x320] sm:$0xff]  ;;  %v2025_v19 = vld [vmem:[%s3214_s0 + $0x4a8] sm:$0xff]  ;;  %v26_v20 = vld [vmem:[%s3214_s0 + $0x10] sm:$0xff] }
   0x8   :  { %1005 = vmatpush.msra.mxu2 %v20_v3  ;;  %1415 = vmatpush.msra.mxu3 %v20_v3  ;;  %v1827_v21 = vld [vmem:[%s3214_s0 + $0x198] sm:$0xff]  ;;  %v1927_v22 = vld [vmem:[%s3214_s0 + $0x328] sm:$0xff]  ;;  %v2026_v23 = vld [vmem:[%s3214_s0 + $0x4b0] sm:$0xff] }
   0x9   :  { %234 = vmatpush.msra.mxu0 %v20_v3  ;;  %595 = vmatpush.msra.mxu1 %v20_v3  ;;  %v27_v24 = vld [vmem:[%s3214_s0 + $0x18] sm:$0xff]  ;;  %v1828_v25 = vld [vmem:[%s3214_s0 + $0x1a0] sm:$0xff]  ;;  %v1928_v26 = vld [vmem:[%s3214_s0 + $0x330] sm:$0xff] }
   0xa   :  { %1006 = vmatpush.msra.mxu2 %v19_v4  ;;  %1416 = vmatpush.msra.mxu3 %v19_v4  ;;  %v2027_v27 = vld [vmem:[%s3214_s0 + $0x4b8] sm:$0xff]  ;;  %v28_v28 = vld [vmem:[%s3214_s0 + $0x20] sm:$0xff]  ;;  %v1829_v29 = vld [vmem:[%s3214_s0 + $0x1a8] sm:$0xff] }
   0xb   :  { %235 = vmatpush.msra.mxu0 %v19_v4  ;;  %596 = vmatpush.msra.mxu1 %v19_v4  ;;  %v1929_v30 = vld [vmem:[%s3214_s0 + $0x338] sm:$0xff]  ;;  %v2028_v31 = vld [vmem:[%s3214_s0 + $0x4c0] sm:$0xff]  ;;  %v29_v32 = vld [vmem:[%s3214_s0 + $0x28] sm:$0xff] }
   0xc   :  { %1007 = vmatpush.msra.mxu2 %v18_v5  ;;  %1417 = vmatpush.msra.mxu3 %v18_v5  ;;  %v1830_v33 = vld [vmem:[%s3214_s0 + $0x1b0] sm:$0xff]  ;;  %v1930_v34 = vld [vmem:[%s3214_s0 + $0x340] sm:$0xff]  ;;  %v2029_v35 = vld [vmem:[%s3214_s0 + $0x4c8] sm:$0xff] }
   0xd   :  { %236 = vmatpush.msra.mxu0 %v18_v5  ;;  %597 = vmatpush.msra.mxu1 %v18_v5  ;;  %v30_v36 = vld [vmem:[%s3214_s0 + $0x30] sm:$0xff]  ;;  %v1831_v37 = vld [vmem:[%s3214_s0 + $0x1b8] sm:$0xff]  ;;  %v1931_v38 = vld [vmem:[%s3214_s0 + $0x348] sm:$0xff] }
   0xe   :  { %1008 = vmatpush.msra.mxu2 %v17_v6  ;;  %1418 = vmatpush.msra.mxu3 %v17_v6  ;;  %v2030_v39 = vld [vmem:[%s3214_s0 + $0x4d0] sm:$0xff]  ;;  %v31_v40 = vld [vmem:[%s3214_s0 + $0x38] sm:$0xff]  ;;  %v1832_v41 = vld [vmem:[%s3214_s0 + $0x1c0] sm:$0xff] }
   0xf   :  { %237 = vmatpush.msra.mxu0 %v17_v6  ;;  %598 = vmatpush.msra.mxu1 %v17_v6  ;;  %v1932_v42 = vld [vmem:[%s3214_s0 + $0x350] sm:$0xff]  ;;  %v2031_v43 = vld [vmem:[%s3214_s0 + $0x4d8] sm:$0xff]  ;;  %v32_v44 = vld [vmem:[%s3214_s0 + $0x40] sm:$0xff] }
  0x10   :  { %1009 = vmatpush.msra.mxu2 %v16_v7  ;;  %1419 = vmatpush.msra.mxu3 %v16_v7  ;;  %v1833_v45 = vld [vmem:[%s3214_s0 + $0x1c8] sm:$0xff]  ;;  %v1933_v46 = vld [vmem:[%s3214_s0 + $0x358] sm:$0xff]  ;;  %v2032_v47 = vld [vmem:[%s3214_s0 + $0x4e0] sm:$0xff] }
  0x11   :  { %238 = vmatpush.msra.mxu0 %v16_v7  ;;  %599 = vmatpush.msra.mxu1 %v16_v7  ;;  %v33_v48 = vld [vmem:[%s3214_s0 + $0x48] sm:$0xff]  ;;  %v1834_v49 = vld [vmem:[%s3214_s0 + $0x1d0] sm:$0xff]  ;;  %v1934_v50 = vld [vmem:[%s3214_s0 + $0x360] sm:$0xff] }
  0x12   :  { %1010 = vmatpush.msra.mxu2 %v15_v8  ;;  %1420 = vmatpush.msra.mxu3 %v15_v8  ;;  %v2033_v51 = vld [vmem:[%s3214_s0 + $0x4e8] sm:$0xff]  ;;  %v34_v52 = vld [vmem:[%s3214_s0 + $0x50] sm:$0xff]  ;;  %v1835_v53 = vld [vmem:[%s3214_s0 + $0x1d8] sm:$0xff] }
  0x13   :  { %239 = vmatpush.msra.mxu0 %v15_v8  ;;  %600 = vmatpush.msra.mxu1 %v15_v8  ;;  %v1935_v54 = vld [vmem:[%s3214_s0 + $0x368] sm:$0xff]  ;;  %v2034_v55 = vld [vmem:[%s3214_s0 + $0x4f0] sm:$0xff]  ;;  %v35_v56 = vld [vmem:[%s3214_s0 + $0x58] sm:$0xff] }
  0x14   :  { %1011 = vmatpush.msra.mxu2 %v14_v9  ;;  %1421 = vmatpush.msra.mxu3 %v14_v9  ;;  %v1836_v57 = vld [vmem:[%s3214_s0 + $0x1e0] sm:$0xff]  ;;  %v1936_v58 = vld [vmem:[%s3214_s0 + $0x370] sm:$0xff]  ;;  %v2035_v59 = vld [vmem:[%s3214_s0 + $0x4f8] sm:$0xff] }
  0x15   :  { %1974 = vmatmul.msk.f32.vlgmr.msra.gmra.mxu2 %vm73_vm1, %v1924_v10  ;;  %2073 = vmatmul.msk.f32.vlgmr.msra.gmra.mxu3 %vm73_vm1, %v2023_v11  ;;  %v36_v60 = vld [vmem:[%s3214_s0 + $0x60] sm:$0xff]  ;;  %v1837_v61 = vld [vmem:[%s3214_s0 + $0x1e8] sm:$0xff]  ;;  %v1937_v62 = vld [vmem:[%s3214_s0 + $0x378] sm:$0xff] }
  0x16   :  { %240 = vmatpush.msra.mxu0 %v14_v9  ;;  %601 = vmatpush.msra.mxu1 %v14_v9  ;;  %v2036_v63 = vld [vmem:[%s3214_s0 + $0x500] sm:$0xff]  ;;  %v37_v0 = vld [vmem:[%s3214_s0 + $0x68] sm:$0xff]  ;;  %v1838_v1 = vld [vmem:[%s3214_s0 + $0x1f0] sm:$0xff] }
  0x17   :  { %1776 = vmatmul.msk.f32.vlgmr.msra.gmra.mxu0 %vm73_vm1, %v24_v12  ;;  %1875 = vmatmul.msk.f32.vlgmr.msra.gmra.mxu1 %vm73_vm1, %v1825_v13  ;;  %v1938_v2 = vld [vmem:[%s3214_s0 + $0x380] sm:$0xff]  ;;  %v2037_v3 = vld [vmem:[%s3214_s0 + $0x508] sm:$0xff]  ;;  %v38_v4 = vld [vmem:[%s3214_s0 + $0x70] sm:$0xff] }
  0x18   :  { %v1839_v5 = vld [vmem:[%s3214_s0 + $0x1f8] sm:$0xff]  ;;  %v1939_v6 = vld [vmem:[%s3214_s0 + $0x388] sm:$0xff]  ;;  %v2038_v7 = vld [vmem:[%s3214_s0 + $0x510] sm:$0xff] }
  0x19   :  { %v39_v8 = vld [vmem:[%s3214_s0 + $0x78] sm:$0xff]  ;;  %v1840_v9 = vld [vmem:[%s3214_s0 + $0x200] sm:$0xff]  ;;  %v1940_v10 = vld [vmem:[%s3214_s0 + $0x390] sm:$0xff] }
  0x1a   :  { %v2039_v11 = vld [vmem:[%s3214_s0 + $0x518] sm:$0xff] }
  0x1d   :  { %1975 = vmatmul.msk.f32.gmra.mxu2 %vm73_vm1, %v1925_v14  ;;  %2074 = vmatmul.msk.f32.gmra.mxu3 %vm73_vm1, %v2024_v15  ;;  %v40_v14 = vld [vmem:[%s3214_s0 + $0x80] sm:$0xff]  ;;  %v1841_v15 = vld [vmem:[%s3214_s0 + $0x208] sm:$0xff] }
  0x1f   :  { %1777 = vmatmul.msk.f32.gmra.mxu0 %vm73_vm1, %v25_v16  ;;  %1876 = vmatmul.msk.f32.gmra.mxu1 %vm73_vm1, %v1826_v17 }
  0x25   :  { %1976 = vmatmul.msk.f32.gmra.mxu2 %vm73_vm1, %v1926_v18  ;;  %2075 = vmatmul.msk.f32.gmra.mxu3 %vm73_vm1, %v2025_v19 }
  0x27   :  { %1778 = vmatmul.msk.f32.gmra.mxu0 %vm73_vm1, %v26_v20  ;;  %1877 = vmatmul.msk.f32.gmra.mxu1 %vm73_vm1, %v1827_v21  ;;  %v2449_v20 = vld [vmem:[%s3215_s2] ss:$0 sm:$0xff]  ;;  %v1941_v21 = vld [vmem:[%s3214_s0 + $0x398] sm:$0xff] }
  0x2d   :  { %1977 = vmatmul.msk.f32.gmra.mxu2 %vm73_vm1, %v1927_v22  ;;  %2076 = vmatmul.msk.f32.gmra.mxu3 %vm73_vm1, %v2026_v23  ;;  %v2040_v22 = vld [vmem:[%s3214_s0 + $0x520] sm:$0xff] }
  0x2f   :  { %1779 = vmatmul.msk.f32.gmra.mxu0 %vm73_vm1, %v27_v24  ;;  %1878 = vmatmul.msk.f32.gmra.mxu1 %vm73_vm1, %v1828_v25 }
  0x35   :  { %1978 = vmatmul.msk.f32.gmra.mxu2 %vm73_vm1, %v1928_v26  ;;  %2077 = vmatmul.msk.f32.gmra.mxu3 %vm73_vm1, %v2027_v27  ;;  %v41_v26 = vld [vmem:[%s3214_s0 + $0x88] sm:$0xff]  ;;  %v1842_v27 = vld [vmem:[%s3214_s0 + $0x210] sm:$0xff] }
  0x37   :  { %1780 = vmatmul.msk.f32.gmra.mxu0 %vm73_vm1, %v28_v28  ;;  %1879 = vmatmul.msk.f32.gmra.mxu1 %vm73_vm1, %v1829_v29 }
  0x3d   :  { %1979 = vmatmul.msk.f32.gmra.mxu2 %vm73_vm1, %v1929_v30  ;;  %2078 = vmatmul.msk.f32.gmra.mxu3 %vm73_vm1, %v2028_v31 }
  0x3f   :  { %1781 = vmatmul.msk.f32.gmra.mxu0 %vm73_vm1, %v29_v32  ;;  %1880 = vmatmul.msk.f32.gmra.mxu1 %vm73_vm1, %v1830_v33 }
  0x45   :  { %1980 = vmatmul.msk.f32.gmra.mxu2 %vm73_vm1, %v1930_v34  ;;  %2079 = vmatmul.msk.f32.gmra.mxu3 %vm73_vm1, %v2029_v35  ;;  %v1942_v34 = vld [vmem:[%s3214_s0 + $0x3a0] sm:$0xff]  ;;  %v2041_v35 = vld [vmem:[%s3214_s0 + $0x528] sm:$0xff] }
  0x47   :  { %1782 = vmatmul.msk.f32.gmra.mxu0 %vm73_vm1, %v30_v36  ;;  %1881 = vmatmul.msk.f32.gmra.mxu1 %vm73_vm1, %v1831_v37 }
  0x4d   :  { %1981 = vmatmul.msk.f32.gmra.mxu2 %vm73_vm1, %v1931_v38  ;;  %2080 = vmatmul.msk.f32.gmra.mxu3 %vm73_vm1, %v2030_v39  ;;  %v42_v39 = vld [vmem:[%s3214_s0 + $0x90] sm:$0xff] }
  0x4f   :  { %1783 = vmatmul.msk.f32.gmra.mxu0 %vm73_vm1, %v31_v40  ;;  %1882 = vmatmul.msk.f32.gmra.mxu1 %vm73_vm1, %v1832_v41  ;;  %v1843_v40 = vld [vmem:[%s3214_s0 + $0x218] sm:$0xff] }
  0x55   :  { %1982 = vmatmul.msk.f32.gmra.mxu2 %vm73_vm1, %v1932_v42  ;;  %2081 = vmatmul.msk.f32.gmra.mxu3 %vm73_vm1, %v2031_v43 }
  0x57   :  { %1784 = vmatmul.msk.f32.gmra.mxu0 %vm73_vm1, %v32_v44  ;;  %1883 = vmatmul.msk.f32.gmra.mxu1 %vm73_vm1, %v1833_v45 }
  0x5d   :  { %1983 = vmatmul.msk.f32.gmra.mxu2 %vm73_vm1, %v1933_v46  ;;  %2082 = vmatmul.msk.f32.gmra.mxu3 %vm73_vm1, %v2032_v47  ;;  %v1943_v47 = vld [vmem:[%s3214_s0 + $0x3a8] sm:$0xff] }
  0x5f   :  { %1785 = vmatmul.msk.f32.gmra.mxu0 %vm73_vm1, %v33_v48  ;;  %1884 = vmatmul.msk.f32.gmra.mxu1 %vm73_vm1, %v1834_v49  ;;  %v2042_v48 = vld [vmem:[%s3214_s0 + $0x530] sm:$0xff] }
  0x65   :  { %1984 = vmatmul.msk.f32.gmra.mxu2 %vm73_vm1, %v1934_v50  ;;  %2083 = vmatmul.msk.f32.gmra.mxu3 %vm73_vm1, %v2033_v51 }
  0x67   :  { %1786 = vmatmul.msk.f32.gmra.mxu0 %vm73_vm1, %v34_v52  ;;  %1885 = vmatmul.msk.f32.gmra.mxu1 %vm73_vm1, %v1835_v53  ;;  %v43_v52 = vld [vmem:[%s3214_s0 + $0x98] sm:$0xff]  ;;  %v1844_v53 = vld [vmem:[%s3214_s0 + $0x220] sm:$0xff] }
  0x6d   :  { %1985 = vmatmul.msk.f32.gmra.mxu2 %vm73_vm1, %v1935_v54  ;;  %2084 = vmatmul.msk.f32.gmra.mxu3 %vm73_vm1, %v2034_v55 }
  0x6f   :  { %1787 = vmatmul.msk.f32.gmra.mxu0 %vm73_vm1, %v35_v56  ;;  %1886 = vmatmul.msk.f32.gmra.mxu1 %vm73_vm1, %v1836_v57 }
  0x75   :  { %1986 = vmatmul.msk.f32.gmra.mxu2 %vm73_vm1, %v1936_v58  ;;  %2085 = vmatmul.msk.f32.gmra.mxu3 %vm73_vm1, %v2035_v59 }
  0x77   :  { %1788 = vmatmul.msk.f32.gmra.mxu0 %vm73_vm1, %v36_v60  ;;  %1887 = vmatmul.msk.f32.gmra.mxu1 %vm73_vm1, %v1837_v61  ;;  %v1944_v60 = vld [vmem:[%s3214_s0 + $0x3b0] sm:$0xff]  ;;  %v2043_v61 = vld [vmem:[%s3214_s0 + $0x538] sm:$0xff] }
  0x7d   :  { %1987 = vmatmul.msk.f32.gmra.mxu2 %vm73_vm1, %v1937_v62  ;;  %2086 = vmatmul.msk.f32.gmra.mxu3 %vm73_vm1, %v2036_v63 }
  0x7f   :  { %1789 = vmatmul.msk.f32.gmra.mxu0 %vm73_vm1, %v37_v0  ;;  %1888 = vmatmul.msk.f32.gmra.mxu1 %vm73_vm1, %v1838_v1  ;;  %v44_v1 = vld [vmem:[%s3214_s0 + $0xa0] sm:$0xff] }
  0x85   :  { %1988 = vmatmul.msk.f32.gmra.mxu2 %vm73_vm1, %v1938_v2  ;;  %2087 = vmatmul.msk.f32.gmra.mxu3 %vm73_vm1, %v2037_v3  ;;  %v1845_v2 = vld [vmem:[%s3214_s0 + $0x228] sm:$0xff] }
  0x87   :  { %1790 = vmatmul.msk.f32.gmra.mxu0 %vm73_vm1, %v38_v4  ;;  %1889 = vmatmul.msk.f32.gmra.mxu1 %vm73_vm1, %v1839_v5 }
  0x8d   :  { %1989 = vmatmul.msk.f32.gmra.mxu2 %vm73_vm1, %v1939_v6  ;;  %2088 = vmatmul.msk.f32.gmra.mxu3 %vm73_vm1, %v2038_v7 }
  0x8f   :  { %1791 = vmatmul.msk.f32.gmra.mxu0 %vm73_vm1, %v39_v8  ;;  %1890 = vmatmul.msk.f32.gmra.mxu1 %vm73_vm1, %v1840_v9  ;;  %v1945_v9 = vld [vmem:[%s3214_s0 + $0x3b8] sm:$0xff] }
  0x94   :  { %v242_v12 = vpop.f32.mrf.mxu0  ;;  %v603_v13 = vpop.f32.mrf.mxu1 }
  0x95   :  { %1990 = vmatmul.msk.f32.gmra.mxu2 %vm73_vm1, %v1940_v10  ;;  %v750_v16 = vmax.f32 %v242_v12, %v603_v13  ;;  %2089 = vmatmul.msk.f32.gmra.mxu3 %vm73_vm1, %v2039_v11  ;;  %v2044_v10 = vld [vmem:[%s3214_s0 + $0x540] sm:$0xff] }
  0x97   :  { %1792 = vmatmul.msk.f32.gmra.mxu0 %vm73_vm1, %v40_v14  ;;  %1891 = vmatmul.msk.f32.gmra.mxu1 %vm73_vm1, %v1841_v15  ;;  %v45_v14 = vld [vmem:[%s3214_s0 + $0xa8] sm:$0xff]  ;;  %v1846_v15 = vld [vmem:[%s3214_s0 + $0x230] sm:$0xff] }
  0x98   :  { %v1013_v17 = vpop.f32.mrf.mxu2  ;;  %v1423_v18 = vpop.f32.mrf.mxu3 }
  0x99   :  { %v1160_v19 = vmax.f32 %v750_v16, %v1013_v17 }
  0x9b   :  { %v1570_v23 = vmax.f32 %v1160_v19, %v1423_v18 }
  0x9c   :  { %v245_v24 = vpop.f32.mrf.mxu0  ;;  %v606_v25 = vpop.f32.mrf.mxu1 }
  0x9d   :  { %v1623_v28 = vadd.f32 %v2449_v20, %v1570_v23  ;;  %1991 = vmatmul.msk.f32.gmra.mxu2 %vm73_vm1, %v1941_v21  ;;  %v751_v29 = vmax.f32 %v245_v24, %v606_v25  ;;  %2090 = vmatmul.msk.f32.gmra.mxu3 %vm73_vm1, %v2040_v22  ;;  %v1946_v23 = vld [vmem:[%s3214_s0 + $0x3c0] sm:$0xff]  ;;  %v2045_v24 = vld [vmem:[%s3214_s0 + $0x548] sm:$0xff] }
  0x9f   :  { %v1672_v30 = vmax.f32 %v1623_v28, 0.0  ;;  %1793 = vmatmul.msk.f32.gmra.mxu0 %vm73_vm1, %v41_v26  ;;  %1892 = vmatmul.msk.f32.gmra.mxu1 %vm73_vm1, %v1842_v27  ;;  %v46_v28 = vld [vmem:[%s3214_s0 + $0xb0] sm:$0xff] }
  0xa0   :  { %v1016_v31 = vpop.f32.mrf.mxu2  ;;  %v1426_v32 = vpop.f32.mrf.mxu3 }
  0xa1   :  { %1722 = vst.msk [vmem:[%s3216_s3] sm:$0xff] %vm1721_vm2, %v1672_v30  ;;  %v1161_v33 = vmax.f32 %v751_v29, %v1016_v31  ;;  %v1847_v29 = vld [vmem:[%s3214_s0 + $0x238] sm:$0xff] }
  0xa3   :  { %v1571_v36 = vmax.f32 %v1161_v33, %v1426_v32 }
  0xa4   :  { %v248_v37 = vpop.f32.mrf.mxu0  ;;  %v609_v38 = vpop.f32.mrf.mxu1 }
  0xa5   :  { %v1624_v41 = vadd.f32 %v2449_v20, %v1571_v36  ;;  %1992 = vmatmul.msk.f32.gmra.mxu2 %vm73_vm1, %v1942_v34  ;;  %v752_v42 = vmax.f32 %v248_v37, %v609_v38  ;;  %2091 = vmatmul.msk.f32.gmra.mxu3 %vm73_vm1, %v2041_v35  ;;  %v1947_v36 = vld [vmem:[%s3214_s0 + $0x3c8] sm:$0xff]  ;;  %v2046_v37 = vld [vmem:[%s3214_s0 + $0x550] sm:$0xff] }
  0xa7   :  { %v1673_v43 = vmax.f32 %v1624_v41, 0.0  ;;  %1794 = vmatmul.msk.f32.gmra.mxu0 %vm73_vm1, %v42_v39  ;;  %1893 = vmatmul.msk.f32.gmra.mxu1 %vm73_vm1, %v1843_v40  ;;  %v47_v41 = vld [vmem:[%s3214_s0 + $0xb8] sm:$0xff] }
  0xa8   :  { %v1019_v44 = vpop.f32.mrf.mxu2  ;;  %v1429_v45 = vpop.f32.mrf.mxu3 }
  0xa9   :  { %1723 = vst.msk [vmem:[%s3216_s3 + $0x8] sm:$0xff] %vm1721_vm2, %v1673_v43  ;;  %v1162_v46 = vmax.f32 %v752_v42, %v1019_v44  ;;  %v1848_v42 = vld [vmem:[%s3214_s0 + $0x240] sm:$0xff] }
  0xab   :  { %v1572_v49 = vmax.f32 %v1162_v46, %v1429_v45 }
  0xac   :  { %v251_v50 = vpop.f32.mrf.mxu0  ;;  %v612_v51 = vpop.f32.mrf.mxu1 }
  0xad   :  { %v1625_v54 = vadd.f32 %v2449_v20, %v1572_v49  ;;  %1993 = vmatmul.msk.f32.gmra.mxu2 %vm73_vm1, %v1943_v47  ;;  %v753_v55 = vmax.f32 %v251_v50, %v612_v51  ;;  %2092 = vmatmul.msk.f32.gmra.mxu3 %vm73_vm1, %v2042_v48  ;;  %v1948_v49 = vld [vmem:[%s3214_s0 + $0x3d0] sm:$0xff]  ;;  %v2047_v50 = vld [vmem:[%s3214_s0 + $0x558] sm:$0xff] }
  0xaf   :  { %v1674_v56 = vmax.f32 %v1625_v54, 0.0  ;;  %1795 = vmatmul.msk.f32.gmra.mxu0 %vm73_vm1, %v43_v52  ;;  %1894 = vmatmul.msk.f32.gmra.mxu1 %vm73_vm1, %v1844_v53  ;;  %v48_v54 = vld [vmem:[%s3214_s0 + $0xc0] sm:$0xff] }
  0xb0   :  { %v1022_v57 = vpop.f32.mrf.mxu2  ;;  %v1432_v58 = vpop.f32.mrf.mxu3 }
  0xb1   :  { %1724 = vst.msk [vmem:[%s3216_s3 + $0x10] sm:$0xff] %vm1721_vm2, %v1674_v56  ;;  %v1163_v59 = vmax.f32 %v753_v55, %v1022_v57  ;;  %v1849_v55 = vld [vmem:[%s3214_s0 + $0x248] sm:$0xff] }
  0xb3   :  { %v1573_v62 = vmax.f32 %v1163_v59, %v1432_v58 }
  0xb4   :  { %v254_v63 = vpop.f32.mrf.mxu0  ;;  %v615_v0 = vpop.f32.mrf.mxu1 }
  0xb5   :  { %v1626_v3 = vadd.f32 %v2449_v20, %v1573_v62  ;;  %1994 = vmatmul.msk.f32.gmra.mxu2 %vm73_vm1, %v1944_v60  ;;  %v754_v4 = vmax.f32 %v254_v63, %v615_v0  ;;  %2093 = vmatmul.msk.f32.gmra.mxu3 %vm73_vm1, %v2043_v61  ;;  %v1949_v62 = vld [vmem:[%s3214_s0 + $0x3d8] sm:$0xff]  ;;  %v2048_v63 = vld [vmem:[%s3214_s0 + $0x560] sm:$0xff] }
  0xb7   :  { %v1675_v5 = vmax.f32 %v1626_v3, 0.0  ;;  %1796 = vmatmul.msk.f32.gmra.mxu0 %vm73_vm1, %v44_v1  ;;  %1895 = vmatmul.msk.f32.gmra.mxu1 %vm73_vm1, %v1845_v2  ;;  %v49_v3 = vld [vmem:[%s3214_s0 + $0xc8] sm:$0xff] }
  0xb8   :  { %v1025_v6 = vpop.f32.mrf.mxu2  ;;  %v1435_v7 = vpop.f32.mrf.mxu3 }
  0xb9   :  { %1725 = vst.msk [vmem:[%s3216_s3 + $0x18] sm:$0xff] %vm1721_vm2, %v1675_v5  ;;  %v1164_v8 = vmax.f32 %v754_v4, %v1025_v6  ;;  %v1850_v4 = vld [vmem:[%s3214_s0 + $0x250] sm:$0xff] }
  0xbb   :  { %v1574_v11 = vmax.f32 %v1164_v8, %v1435_v7 }
  0xbc   :  { %v257_v12 = vpop.f32.mrf.mxu0  ;;  %v618_v13 = vpop.f32.mrf.mxu1 }
  0xbd   :  { %v1627_v16 = vadd.f32 %v2449_v20, %v1574_v11  ;;  %1995 = vmatmul.msk.f32.gmra.mxu2 %vm73_vm1, %v1945_v9  ;;  %v755_v17 = vmax.f32 %v257_v12, %v618_v13  ;;  %2094 = vmatmul.msk.f32.gmra.mxu3 %vm73_vm1, %v2044_v10  ;;  %v1950_v11 = vld [vmem:[%s3214_s0 + $0x3e0] sm:$0xff]  ;;  %v2049_v12 = vld [vmem:[%s3214_s0 + $0x568] sm:$0xff] }
  0xbf   :  { %v1676_v18 = vmax.f32 %v1627_v16, 0.0  ;;  %1797 = vmatmul.msk.f32.gmra.mxu0 %vm73_vm1, %v45_v14  ;;  %1896 = vmatmul.msk.f32.gmra.mxu1 %vm73_vm1, %v1846_v15  ;;  %v50_v16 = vld [vmem:[%s3214_s0 + $0xd0] sm:$0xff] }
  0xc0   :  { %v1028_v19 = vpop.f32.mrf.mxu2  ;;  %v1438_v21 = vpop.f32.mrf.mxu3 }
  0xc1   :  { %1726 = vst.msk [vmem:[%s3216_s3 + $0x20] sm:$0xff] %vm1721_vm2, %v1676_v18  ;;  %v1165_v22 = vmax.f32 %v755_v17, %v1028_v19  ;;  %v1851_v17 = vld [vmem:[%s3214_s0 + $0x258] sm:$0xff] }
  0xc3   :  { %v1575_v25 = vmax.f32 %v1165_v22, %v1438_v21 }
  0xc4   :  { %v260_v26 = vpop.f32.mrf.mxu0  ;;  %v621_v27 = vpop.f32.mrf.mxu1 }
  0xc5   :  { %v1628_v30 = vadd.f32 %v2449_v20, %v1575_v25  ;;  %1996 = vmatmul.msk.f32.gmra.mxu2 %vm73_vm1, %v1946_v23  ;;  %v756_v31 = vmax.f32 %v260_v26, %v621_v27  ;;  %2095 = vmatmul.msk.f32.gmra.mxu3 %vm73_vm1, %v2045_v24  ;;  %v1951_v25 = vld [vmem:[%s3214_s0 + $0x3e8] sm:$0xff]  ;;  %v2050_v26 = vld [vmem:[%s3214_s0 + $0x570] sm:$0xff] }
  0xc7   :  { %v1677_v32 = vmax.f32 %v1628_v30, 0.0  ;;  %1798 = vmatmul.msk.f32.gmra.mxu0 %vm73_vm1, %v46_v28  ;;  %1897 = vmatmul.msk.f32.gmra.mxu1 %vm73_vm1, %v1847_v29  ;;  %v51_v30 = vld [vmem:[%s3214_s0 + $0xd8] sm:$0xff] }
  0xc8   :  { %v1031_v33 = vpop.f32.mrf.mxu2  ;;  %v1441_v34 = vpop.f32.mrf.mxu3 }
  0xc9   :  { %1727 = vst.msk [vmem:[%s3216_s3 + $0x28] sm:$0xff] %vm1721_vm2, %v1677_v32  ;;  %v1166_v35 = vmax.f32 %v756_v31, %v1031_v33  ;;  %v1852_v31 = vld [vmem:[%s3214_s0 + $0x260] sm:$0xff] }
  0xcb   :  { %v1576_v38 = vmax.f32 %v1166_v35, %v1441_v34 }
  0xcc   :  { %v263_v39 = vpop.f32.mrf.mxu0  ;;  %v624_v40 = vpop.f32.mrf.mxu1 }
  0xcd   :  { %v1629_v43 = vadd.f32 %v2449_v20, %v1576_v38  ;;  %1997 = vmatmul.msk.f32.gmra.mxu2 %vm73_vm1, %v1947_v36  ;;  %v757_v44 = vmax.f32 %v263_v39, %v624_v40  ;;  %2096 = vmatmul.msk.f32.gmra.mxu3 %vm73_vm1, %v2046_v37  ;;  %v1952_v38 = vld [vmem:[%s3214_s0 + $0x3f0] sm:$0xff]  ;;  %v2051_v39 = vld [vmem:[%s3214_s0 + $0x578] sm:$0xff] }
  0xcf   :  { %v1678_v45 = vmax.f32 %v1629_v43, 0.0  ;;  %1799 = vmatmul.msk.f32.gmra.mxu0 %vm73_vm1, %v47_v41  ;;  %1898 = vmatmul.msk.f32.gmra.mxu1 %vm73_vm1, %v1848_v42  ;;  %v52_v43 = vld [vmem:[%s3214_s0 + $0xe0] sm:$0xff] }
  0xd0   :  { %v1034_v46 = vpop.f32.mrf.mxu2  ;;  %v1444_v47 = vpop.f32.mrf.mxu3 }
  0xd1   :  { %1728 = vst.msk [vmem:[%s3216_s3 + $0x30] sm:$0xff] %vm1721_vm2, %v1678_v45  ;;  %v1167_v48 = vmax.f32 %v757_v44, %v1034_v46  ;;  %v1853_v44 = vld [vmem:[%s3214_s0 + $0x268] sm:$0xff] }
  0xd3   :  { %v1577_v51 = vmax.f32 %v1167_v48, %v1444_v47 }
  0xd4   :  { %v266_v52 = vpop.f32.mrf.mxu0  ;;  %v627_v53 = vpop.f32.mrf.mxu1 }
  0xd5   :  { %v1630_v56 = vadd.f32 %v2449_v20, %v1577_v51  ;;  %1998 = vmatmul.msk.f32.gmra.mxu2 %vm73_vm1, %v1948_v49  ;;  %v758_v57 = vmax.f32 %v266_v52, %v627_v53  ;;  %2097 = vmatmul.msk.f32.gmra.mxu3 %vm73_vm1, %v2047_v50  ;;  %v1953_v51 = vld [vmem:[%s3214_s0 + $0x3f8] sm:$0xff]  ;;  %v2052_v52 = vld [vmem:[%s3214_s0 + $0x580] sm:$0xff] }
  0xd7   :  { %v1679_v58 = vmax.f32 %v1630_v56, 0.0  ;;  %1800 = vmatmul.msk.f32.gmra.mxu0 %vm73_vm1, %v48_v54  ;;  %1899 = vmatmul.msk.f32.gmra.mxu1 %vm73_vm1, %v1849_v55  ;;  %v53_v56 = vld [vmem:[%s3214_s0 + $0xe8] sm:$0xff] }
  0xd8   :  { %v1037_v59 = vpop.f32.mrf.mxu2  ;;  %v1447_v60 = vpop.f32.mrf.mxu3 }
  0xd9   :  { %1729 = vst.msk [vmem:[%s3216_s3 + $0x38] sm:$0xff] %vm1721_vm2, %v1679_v58  ;;  %v1168_v61 = vmax.f32 %v758_v57, %v1037_v59  ;;  %v1854_v57 = vld [vmem:[%s3214_s0 + $0x270] sm:$0xff] }
  0xdb   :  { %v1578_v0 = vmax.f32 %v1168_v61, %v1447_v60 }
  0xdc   :  { %v269_v1 = vpop.f32.mrf.mxu0  ;;  %v630_v2 = vpop.f32.mrf.mxu1 }
  0xdd   :  { %v1631_v5 = vadd.f32 %v2449_v20, %v1578_v0  ;;  %1999 = vmatmul.msk.f32.gmra.mxu2 %vm73_vm1, %v1949_v62  ;;  %v759_v6 = vmax.f32 %v269_v1, %v630_v2  ;;  %2098 = vmatmul.msk.f32.gmra.mxu3 %vm73_vm1, %v2048_v63  ;;  %v1954_v0 = vld [vmem:[%s3214_s0 + $0x400] sm:$0xff]  ;;  %v2053_v1 = vld [vmem:[%s3214_s0 + $0x588] sm:$0xff] }
  0xdf   :  { %v1680_v7 = vmax.f32 %v1631_v5, 0.0  ;;  %1801 = vmatmul.msk.f32.gmra.mxu0 %vm73_vm1, %v49_v3  ;;  %1900 = vmatmul.msk.f32.gmra.mxu1 %vm73_vm1, %v1850_v4  ;;  %v54_v5 = vld [vmem:[%s3214_s0 + $0xf0] sm:$0xff] }
  0xe0   :  { %v1040_v8 = vpop.f32.mrf.mxu2  ;;  %v1450_v9 = vpop.f32.mrf.mxu3 }
  0xe1   :  { %1730 = vst.msk [vmem:[%s3216_s3 + $0x40] sm:$0xff] %vm1721_vm2, %v1680_v7  ;;  %v1169_v10 = vmax.f32 %v759_v6, %v1040_v8  ;;  %v1855_v6 = vld [vmem:[%s3214_s0 + $0x278] sm:$0xff] }
  0xe3   :  { %v1579_v13 = vmax.f32 %v1169_v10, %v1450_v9 }
  0xe4   :  { %v272_v14 = vpop.f32.mrf.mxu0  ;;  %v633_v15 = vpop.f32.mrf.mxu1 }
  0xe5   :  { %v1632_v18 = vadd.f32 %v2449_v20, %v1579_v13  ;;  %2000 = vmatmul.msk.f32.gmra.mxu2 %vm73_vm1, %v1950_v11  ;;  %v760_v19 = vmax.f32 %v272_v14, %v633_v15  ;;  %2099 = vmatmul.msk.f32.gmra.mxu3 %vm73_vm1, %v2049_v12  ;;  %v1955_v13 = vld [vmem:[%s3214_s0 + $0x408] sm:$0xff]  ;;  %v2054_v14 = vld [vmem:[%s3214_s0 + $0x590] sm:$0xff] }
  0xe7   :  { %v1681_v21 = vmax.f32 %v1632_v18, 0.0  ;;  %1802 = vmatmul.msk.f32.gmra.mxu0 %vm73_vm1, %v50_v16  ;;  %1901 = vmatmul.msk.f32.gmra.mxu1 %vm73_vm1, %v1851_v17  ;;  %v55_v18 = vld [vmem:[%s3214_s0 + $0xf8] sm:$0xff] }
  0xe8   :  { %v1043_v22 = vpop.f32.mrf.mxu2  ;;  %v1453_v23 = vpop.f32.mrf.mxu3 }
  0xe9   :  { %1731 = vst.msk [vmem:[%s3216_s3 + $0x48] sm:$0xff] %vm1721_vm2, %v1681_v21  ;;  %v1170_v24 = vmax.f32 %v760_v19, %v1043_v22  ;;  %v1856_v19 = vld [vmem:[%s3214_s0 + $0x280] sm:$0xff] }
  0xeb   :  { %v1580_v27 = vmax.f32 %v1170_v24, %v1453_v23 }
  0xec   :  { %v275_v28 = vpop.f32.mrf.mxu0  ;;  %v636_v29 = vpop.f32.mrf.mxu1 }
  0xed   :  { %v1633_v32 = vadd.f32 %v2449_v20, %v1580_v27  ;;  %2001 = vmatmul.msk.f32.gmra.mxu2 %vm73_vm1, %v1951_v25  ;;  %v761_v33 = vmax.f32 %v275_v28, %v636_v29  ;;  %2100 = vmatmul.msk.f32.gmra.mxu3 %vm73_vm1, %v2050_v26  ;;  %v1956_v27 = vld [vmem:[%s3214_s0 + $0x410] sm:$0xff]  ;;  %v2055_v28 = vld [vmem:[%s3214_s0 + $0x598] sm:$0xff] }
  0xef   :  { %v1682_v34 = vmax.f32 %v1633_v32, 0.0  ;;  %1803 = vmatmul.msk.f32.gmra.mxu0 %vm73_vm1, %v51_v30  ;;  %1902 = vmatmul.msk.f32.gmra.mxu1 %vm73_vm1, %v1852_v31  ;;  %v56_v32 = vld [vmem:[%s3214_s0 + $0x100] sm:$0xff] }
  0xf0   :  { %v1046_v35 = vpop.f32.mrf.mxu2  ;;  %v1456_v36 = vpop.f32.mrf.mxu3 }
  0xf1   :  { %1732 = vst.msk [vmem:[%s3216_s3 + $0x50] sm:$0xff] %vm1721_vm2, %v1682_v34  ;;  %v1171_v37 = vmax.f32 %v761_v33, %v1046_v35  ;;  %v1857_v33 = vld [vmem:[%s3214_s0 + $0x288] sm:$0xff] }
  0xf3   :  { %v1581_v40 = vmax.f32 %v1171_v37, %v1456_v36 }
  0xf4   :  { %v278_v41 = vpop.f32.mrf.mxu0  ;;  %v639_v42 = vpop.f32.mrf.mxu1 }
  0xf5   :  { %v1634_v45 = vadd.f32 %v2449_v20, %v1581_v40  ;;  %2002 = vmatmul.msk.f32.gmra.mxu2 %vm73_vm1, %v1952_v38  ;;  %v762_v46 = vmax.f32 %v278_v41, %v639_v42  ;;  %2101 = vmatmul.msk.f32.gmra.mxu3 %vm73_vm1, %v2051_v39  ;;  %v1957_v40 = vld [vmem:[%s3214_s0 + $0x418] sm:$0xff]  ;;  %v2056_v41 = vld [vmem:[%s3214_s0 + $0x5a0] sm:$0xff] }
  0xf7   :  { %v1683_v47 = vmax.f32 %v1634_v45, 0.0  ;;  %1804 = vmatmul.msk.f32.gmra.mxu0 %vm73_vm1, %v52_v43  ;;  %1903 = vmatmul.msk.f32.gmra.mxu1 %vm73_vm1, %v1853_v44  ;;  %v57_v45 = vld [vmem:[%s3214_s0 + $0x108] sm:$0xff] }
  0xf8   :  { %v1049_v48 = vpop.f32.mrf.mxu2  ;;  %v1459_v49 = vpop.f32.mrf.mxu3 }
  0xf9   :  { %1733 = vst.msk [vmem:[%s3216_s3 + $0x58] sm:$0xff] %vm1721_vm2, %v1683_v47  ;;  %v1172_v50 = vmax.f32 %v762_v46, %v1049_v48  ;;  %v1858_v46 = vld [vmem:[%s3214_s0 + $0x290] sm:$0xff] }
  0xfb   :  { %v1582_v53 = vmax.f32 %v1172_v50, %v1459_v49 }
  0xfc   :  { %v281_v54 = vpop.f32.mrf.mxu0  ;;  %v642_v55 = vpop.f32.mrf.mxu1 }
  0xfd   :  { %v1635_v58 = vadd.f32 %v2449_v20, %v1582_v53  ;;  %2003 = vmatmul.msk.f32.gmra.mxu2 %vm73_vm1, %v1953_v51  ;;  %v763_v59 = vmax.f32 %v281_v54, %v642_v55  ;;  %2102 = vmatmul.msk.f32.gmra.mxu3 %vm73_vm1, %v2052_v52  ;;  %v1958_v53 = vld [vmem:[%s3214_s0 + $0x420] sm:$0xff]  ;;  %v2057_v54 = vld [vmem:[%s3214_s0 + $0x5a8] sm:$0xff] }
  0xff   :  { %v1684_v60 = vmax.f32 %v1635_v58, 0.0  ;;  %1805 = vmatmul.msk.f32.gmra.mxu0 %vm73_vm1, %v53_v56  ;;  %1904 = vmatmul.msk.f32.gmra.mxu1 %vm73_vm1, %v1854_v57  ;;  %v58_v58 = vld [vmem:[%s3214_s0 + $0x110] sm:$0xff] }
 0x100   :  { %v1052_v61 = vpop.f32.mrf.mxu2  ;;  %v1462_v62 = vpop.f32.mrf.mxu3 }
 0x101   :  { %1734 = vst.msk [vmem:[%s3216_s3 + $0x60] sm:$0xff] %vm1721_vm2, %v1684_v60  ;;  %v1173_v63 = vmax.f32 %v763_v59, %v1052_v61  ;;  %v1859_v59 = vld [vmem:[%s3214_s0 + $0x298] sm:$0xff] }
 0x103   :  { %v1583_v2 = vmax.f32 %v1173_v63, %v1462_v62 }
 0x104   :  { %v284_v3 = vpop.f32.mrf.mxu0  ;;  %v645_v4 = vpop.f32.mrf.mxu1 }
 0x105   :  { %v1636_v7 = vadd.f32 %v2449_v20, %v1583_v2  ;;  %2004 = vmatmul.msk.f32.gmra.mxu2 %vm73_vm1, %v1954_v0  ;;  %v764_v8 = vmax.f32 %v284_v3, %v645_v4  ;;  %2103 = vmatmul.msk.f32.gmra.mxu3 %vm73_vm1, %v2053_v1  ;;  %v1959_v2 = vld [vmem:[%s3214_s0 + $0x428] sm:$0xff]  ;;  %v2058_v3 = vld [vmem:[%s3214_s0 + $0x5b0] sm:$0xff] }
 0x107   :  { %v1685_v9 = vmax.f32 %v1636_v7, 0.0  ;;  %1806 = vmatmul.msk.f32.gmra.mxu0 %vm73_vm1, %v54_v5  ;;  %1905 = vmatmul.msk.f32.gmra.mxu1 %vm73_vm1, %v1855_v6  ;;  %v59_v7 = vld [vmem:[%s3214_s0 + $0x118] sm:$0xff] }
 0x108   :  { %v1055_v10 = vpop.f32.mrf.mxu2  ;;  %v1465_v11 = vpop.f32.mrf.mxu3 }
 0x109   :  { %1735 = vst.msk [vmem:[%s3216_s3 + $0x68] sm:$0xff] %vm1721_vm2, %v1685_v9  ;;  %v1174_v12 = vmax.f32 %v764_v8, %v1055_v10  ;;  %v1860_v8 = vld [vmem:[%s3214_s0 + $0x2a0] sm:$0xff] }
 0x10b   :  { %v1584_v15 = vmax.f32 %v1174_v12, %v1465_v11 }
 0x10c   :  { %v287_v16 = vpop.f32.mrf.mxu0  ;;  %v648_v17 = vpop.f32.mrf.mxu1 }
 0x10d   :  { %v1637_v21 = vadd.f32 %v2449_v20, %v1584_v15  ;;  %2005 = vmatmul.msk.f32.gmra.mxu2 %vm73_vm1, %v1955_v13  ;;  %v765_v22 = vmax.f32 %v287_v16, %v648_v17  ;;  %2104 = vmatmul.msk.f32.gmra.mxu3 %vm73_vm1, %v2054_v14  ;;  %v1960_v15 = vld [vmem:[%s3214_s0 + $0x430] sm:$0xff]  ;;  %v2059_v16 = vld [vmem:[%s3214_s0 + $0x5b8] sm:$0xff] }
 0x10f   :  { %v1686_v23 = vmax.f32 %v1637_v21, 0.0  ;;  %1807 = vmatmul.msk.f32.gmra.mxu0 %vm73_vm1, %v55_v18  ;;  %1906 = vmatmul.msk.f32.gmra.mxu1 %vm73_vm1, %v1856_v19  ;;  %v60_v21 = vld [vmem:[%s3214_s0 + $0x120] sm:$0xff] }
 0x110   :  { %v1058_v24 = vpop.f32.mrf.mxu2  ;;  %v1468_v25 = vpop.f32.mrf.mxu3 }
 0x111   :  { %1736 = vst.msk [vmem:[%s3216_s3 + $0x70] sm:$0xff] %vm1721_vm2, %v1686_v23  ;;  %v1175_v26 = vmax.f32 %v765_v22, %v1058_v24  ;;  %v1861_v22 = vld [vmem:[%s3214_s0 + $0x2a8] sm:$0xff] }
 0x113   :  { %v1585_v29 = vmax.f32 %v1175_v26, %v1468_v25 }
 0x114   :  { %v290_v30 = vpop.f32.mrf.mxu0  ;;  %v651_v31 = vpop.f32.mrf.mxu1 }
 0x115   :  { %v1638_v34 = vadd.f32 %v2449_v20, %v1585_v29  ;;  %2006 = vmatmul.msk.f32.gmra.mxu2 %vm73_vm1, %v1956_v27  ;;  %v766_v35 = vmax.f32 %v290_v30, %v651_v31  ;;  %2105 = vmatmul.msk.f32.gmra.mxu3 %vm73_vm1, %v2055_v28  ;;  %v1961_v29 = vld [vmem:[%s3214_s0 + $0x438] sm:$0xff]  ;;  %v2060_v30 = vld [vmem:[%s3214_s0 + $0x5c0] sm:$0xff] }
 0x117   :  { %v1687_v36 = vmax.f32 %v1638_v34, 0.0  ;;  %1808 = vmatmul.msk.f32.gmra.mxu0 %vm73_vm1, %v56_v32  ;;  %1907 = vmatmul.msk.f32.gmra.mxu1 %vm73_vm1, %v1857_v33  ;;  %v61_v34 = vld [vmem:[%s3214_s0 + $0x128] sm:$0xff] }
 0x118   :  { %v1061_v37 = vpop.f32.mrf.mxu2  ;;  %v1471_v38 = vpop.f32.mrf.mxu3 }
 0x119   :  { %1737 = vst.msk [vmem:[%s3216_s3 + $0x78] sm:$0xff] %vm1721_vm2, %v1687_v36  ;;  %v1176_v39 = vmax.f32 %v766_v35, %v1061_v37  ;;  %v1862_v35 = vld [vmem:[%s3214_s0 + $0x2b0] sm:$0xff] }
 0x11b   :  { %v1586_v42 = vmax.f32 %v1176_v39, %v1471_v38 }
 0x11c   :  { %v293_v43 = vpop.f32.mrf.mxu0  ;;  %v654_v44 = vpop.f32.mrf.mxu1 }
 0x11d   :  { %v1639_v47 = vadd.f32 %v2449_v20, %v1586_v42  ;;  %2007 = vmatmul.msk.f32.gmra.mxu2 %vm73_vm1, %v1957_v40  ;;  %v767_v48 = vmax.f32 %v293_v43, %v654_v44  ;;  %2106 = vmatmul.msk.f32.gmra.mxu3 %vm73_vm1, %v2056_v41  ;;  %v1962_v42 = vld [vmem:[%s3214_s0 + $0x440] sm:$0xff]  ;;  %v2061_v43 = vld [vmem:[%s3214_s0 + $0x5c8] sm:$0xff] }
 0x11f   :  { %v1688_v49 = vmax.f32 %v1639_v47, 0.0  ;;  %1809 = vmatmul.msk.f32.gmra.mxu0 %vm73_vm1, %v57_v45  ;;  %1908 = vmatmul.msk.f32.gmra.mxu1 %vm73_vm1, %v1858_v46  ;;  %v62_v47 = vld [vmem:[%s3214_s0 + $0x130] sm:$0xff] }
 0x120   :  { %v1064_v50 = vpop.f32.mrf.mxu2  ;;  %v1474_v51 = vpop.f32.mrf.mxu3 }
 0x121   :  { %1738 = vst.msk [vmem:[%s3216_s3 + $0x80] sm:$0xff] %vm1721_vm2, %v1688_v49  ;;  %v1177_v52 = vmax.f32 %v767_v48, %v1064_v50  ;;  %v1863_v48 = vld [vmem:[%s3214_s0 + $0x2b8] sm:$0xff] }
 0x123   :  { %v1587_v55 = vmax.f32 %v1177_v52, %v1474_v51 }
 0x124   :  { %v296_v56 = vpop.f32.mrf.mxu0  ;;  %v657_v57 = vpop.f32.mrf.mxu1 }
 0x125   :  { %v1640_v60 = vadd.f32 %v2449_v20, %v1587_v55  ;;  %2008 = vmatmul.msk.f32.gmra.mxu2 %vm73_vm1, %v1958_v53  ;;  %v768_v61 = vmax.f32 %v296_v56, %v657_v57  ;;  %2107 = vmatmul.msk.f32.gmra.mxu3 %vm73_vm1, %v2057_v54  ;;  %v1963_v55 = vld [vmem:[%s3214_s0 + $0x448] sm:$0xff]  ;;  %v2062_v56 = vld [vmem:[%s3214_s0 + $0x5d0] sm:$0xff] }
 0x127   :  { %v1689_v62 = vmax.f32 %v1640_v60, 0.0  ;;  %1810 = vmatmul.msk.f32.gmra.mxu0 %vm73_vm1, %v58_v58  ;;  %1909 = vmatmul.msk.f32.gmra.mxu1 %vm73_vm1, %v1859_v59  ;;  %v63_v60 = vld [vmem:[%s3214_s0 + $0x138] sm:$0xff] }
 0x128   :  { %v1067_v63 = vpop.f32.mrf.mxu2  ;;  %v1477_v0 = vpop.f32.mrf.mxu3 }
 0x129   :  { %1739 = vst.msk [vmem:[%s3216_s3 + $0x88] sm:$0xff] %vm1721_vm2, %v1689_v62  ;;  %v1178_v1 = vmax.f32 %v768_v61, %v1067_v63  ;;  %v1864_v61 = vld [vmem:[%s3214_s0 + $0x2c0] sm:$0xff] }
 0x12b   :  { %v1588_v4 = vmax.f32 %v1178_v1, %v1477_v0 }
 0x12c   :  { %v299_v5 = vpop.f32.mrf.mxu0  ;;  %v660_v6 = vpop.f32.mrf.mxu1 }
 0x12d   :  { %v1641_v9 = vadd.f32 %v2449_v20, %v1588_v4  ;;  %2009 = vmatmul.msk.f32.gmra.mxu2 %vm73_vm1, %v1959_v2  ;;  %v769_v10 = vmax.f32 %v299_v5, %v660_v6  ;;  %2108 = vmatmul.msk.f32.gmra.mxu3 %vm73_vm1, %v2058_v3  ;;  %v1964_v4 = vld [vmem:[%s3214_s0 + $0x450] sm:$0xff]  ;;  %v2063_v5 = vld [vmem:[%s3214_s0 + $0x5d8] sm:$0xff] }
 0x12f   :  { %v1690_v11 = vmax.f32 %v1641_v9, 0.0  ;;  %1811 = vmatmul.msk.f32.gmra.mxu0 %vm73_vm1, %v59_v7  ;;  %1910 = vmatmul.msk.f32.gmra.mxu1 %vm73_vm1, %v1860_v8  ;;  %v64_v9 = vld [vmem:[%s3214_s0 + $0x140] sm:$0xff] }
 0x130   :  { %v1070_v12 = vpop.f32.mrf.mxu2  ;;  %v1480_v13 = vpop.f32.mrf.mxu3 }
 0x131   :  { %1740 = vst.msk [vmem:[%s3216_s3 + $0x90] sm:$0xff] %vm1721_vm2, %v1690_v11  ;;  %v1179_v14 = vmax.f32 %v769_v10, %v1070_v12  ;;  %v1865_v10 = vld [vmem:[%s3214_s0 + $0x2c8] sm:$0xff] }
 0x133   :  { %v1589_v17 = vmax.f32 %v1179_v14, %v1480_v13 }
 0x134   :  { %v302_v18 = vpop.f32.mrf.mxu0  ;;  %v663_v19 = vpop.f32.mrf.mxu1 }
 0x135   :  { %v1642_v23 = vadd.f32 %v2449_v20, %v1589_v17  ;;  %2010 = vmatmul.msk.f32.gmra.mxu2 %vm73_vm1, %v1960_v15  ;;  %v770_v24 = vmax.f32 %v302_v18, %v663_v19  ;;  %2109 = vmatmul.msk.f32.gmra.mxu3 %vm73_vm1, %v2059_v16  ;;  %v1965_v17 = vld [vmem:[%s3214_s0 + $0x458] sm:$0xff]  ;;  %v2064_v18 = vld [vmem:[%s3214_s0 + $0x5e0] sm:$0xff] }
 0x137   :  { %v1691_v25 = vmax.f32 %v1642_v23, 0.0  ;;  %1812 = vmatmul.msk.f32.gmra.mxu0 %vm73_vm1, %v60_v21  ;;  %1911 = vmatmul.msk.f32.gmra.mxu1 %vm73_vm1, %v1861_v22  ;;  %v65_v23 = vld [vmem:[%s3214_s0 + $0x148] sm:$0xff] }
 0x138   :  { %v1073_v26 = vpop.f32.mrf.mxu2  ;;  %v1483_v27 = vpop.f32.mrf.mxu3 }
 0x139   :  { %1741 = vst.msk [vmem:[%s3216_s3 + $0x98] sm:$0xff] %vm1721_vm2, %v1691_v25  ;;  %v1180_v28 = vmax.f32 %v770_v24, %v1073_v26  ;;  %v1866_v24 = vld [vmem:[%s3214_s0 + $0x2d0] sm:$0xff] }
 0x13b   :  { %v1590_v31 = vmax.f32 %v1180_v28, %v1483_v27 }
 0x13c   :  { %v305_v32 = vpop.f32.mrf.mxu0  ;;  %v666_v33 = vpop.f32.mrf.mxu1 }
 0x13d   :  { %v1643_v36 = vadd.f32 %v2449_v20, %v1590_v31  ;;  %2011 = vmatmul.msk.f32.gmra.mxu2 %vm73_vm1, %v1961_v29  ;;  %v771_v37 = vmax.f32 %v305_v32, %v666_v33  ;;  %2110 = vmatmul.msk.f32.gmra.mxu3 %vm73_vm1, %v2060_v30  ;;  %v1966_v31 = vld [vmem:[%s3214_s0 + $0x460] sm:$0xff]  ;;  %v2065_v32 = vld [vmem:[%s3214_s0 + $0x5e8] sm:$0xff] }
 0x13f   :  { %v1692_v38 = vmax.f32 %v1643_v36, 0.0  ;;  %1813 = vmatmul.msk.f32.gmra.mxu0 %vm73_vm1, %v61_v34  ;;  %1912 = vmatmul.msk.f32.gmra.mxu1 %vm73_vm1, %v1862_v35  ;;  %v66_v36 = vld [vmem:[%s3214_s0 + $0x150] sm:$0xff] }
 0x140   :  { %v1076_v39 = vpop.f32.mrf.mxu2  ;;  %v1486_v40 = vpop.f32.mrf.mxu3 }
 0x141   :  { %1742 = vst.msk [vmem:[%s3216_s3 + $0xa0] sm:$0xff] %vm1721_vm2, %v1692_v38  ;;  %v1181_v41 = vmax.f32 %v771_v37, %v1076_v39  ;;  %v1867_v37 = vld [vmem:[%s3214_s0 + $0x2d8] sm:$0xff] }
 0x143   :  { %v1591_v44 = vmax.f32 %v1181_v41, %v1486_v40 }
 0x144   :  { %v308_v45 = vpop.f32.mrf.mxu0  ;;  %v669_v46 = vpop.f32.mrf.mxu1 }
 0x145   :  { %v1644_v49 = vadd.f32 %v2449_v20, %v1591_v44  ;;  %2012 = vmatmul.msk.f32.gmra.mxu2 %vm73_vm1, %v1962_v42  ;;  %v772_v50 = vmax.f32 %v308_v45, %v669_v46  ;;  %2111 = vmatmul.msk.f32.gmra.mxu3 %vm73_vm1, %v2061_v43  ;;  %v1967_v44 = vld [vmem:[%s3214_s0 + $0x468] sm:$0xff]  ;;  %v2066_v45 = vld [vmem:[%s3214_s0 + $0x5f0] sm:$0xff] }
 0x147   :  { %v1693_v51 = vmax.f32 %v1644_v49, 0.0  ;;  %1814 = vmatmul.msk.f32.gmra.mxu0 %vm73_vm1, %v62_v47  ;;  %1913 = vmatmul.msk.f32.gmra.mxu1 %vm73_vm1, %v1863_v48  ;;  %v67_v49 = vld [vmem:[%s3214_s0 + $0x158] sm:$0xff] }
 0x148   :  { %v1079_v52 = vpop.f32.mrf.mxu2  ;;  %v1489_v53 = vpop.f32.mrf.mxu3 }
 0x149   :  { %1743 = vst.msk [vmem:[%s3216_s3 + $0xa8] sm:$0xff] %vm1721_vm2, %v1693_v51  ;;  %v1182_v54 = vmax.f32 %v772_v50, %v1079_v52  ;;  %v1868_v50 = vld [vmem:[%s3214_s0 + $0x2e0] sm:$0xff] }
 0x14b   :  { %v1592_v57 = vmax.f32 %v1182_v54, %v1489_v53 }
 0x14c   :  { %v311_v58 = vpop.f32.mrf.mxu0  ;;  %v672_v59 = vpop.f32.mrf.mxu1 }
 0x14d   :  { %v1645_v62 = vadd.f32 %v2449_v20, %v1592_v57  ;;  %2013 = vmatmul.msk.f32.gmra.mxu2 %vm73_vm1, %v1963_v55  ;;  %v773_v63 = vmax.f32 %v311_v58, %v672_v59  ;;  %2112 = vmatmul.msk.f32.gmra.mxu3 %vm73_vm1, %v2062_v56  ;;  %v1968_v57 = vld [vmem:[%s3214_s0 + $0x470] sm:$0xff]  ;;  %v2067_v58 = vld [vmem:[%s3214_s0 + $0x5f8] sm:$0xff] }
 0x14f   :  { %v1694_v0 = vmax.f32 %v1645_v62, 0.0  ;;  %1815 = vmatmul.msk.f32.gmra.mxu0 %vm73_vm1, %v63_v60  ;;  %1914 = vmatmul.msk.f32.gmra.mxu1 %vm73_vm1, %v1864_v61  ;;  %v68_v62 = vld [vmem:[%s3214_s0 + $0x160] sm:$0xff] }
 0x150   :  { %v1082_v1 = vpop.f32.mrf.mxu2  ;;  %v1492_v2 = vpop.f32.mrf.mxu3 }
 0x151   :  { %1744 = vst.msk [vmem:[%s3216_s3 + $0xb0] sm:$0xff] %vm1721_vm2, %v1694_v0  ;;  %v1183_v3 = vmax.f32 %v773_v63, %v1082_v1  ;;  %v1869_v63 = vld [vmem:[%s3214_s0 + $0x2e8] sm:$0xff] }
 0x153   :  { %v1593_v6 = vmax.f32 %v1183_v3, %v1492_v2 }
 0x154   :  { %v314_v7 = vpop.f32.mrf.mxu0  ;;  %v675_v8 = vpop.f32.mrf.mxu1 }
 0x155   :  { %v1646_v11 = vadd.f32 %v2449_v20, %v1593_v6  ;;  %2014 = vmatmul.msk.f32.gmra.mxu2 %vm73_vm1, %v1964_v4  ;;  %v774_v12 = vmax.f32 %v314_v7, %v675_v8  ;;  %2113 = vmatmul.msk.f32.gmra.mxu3 %vm73_vm1, %v2063_v5  ;;  %v2068_v6 = vld [vmem:[%s3214_s0 + $0x600] sm:$0xff] }
 0x157   :  { %v1695_v13 = vmax.f32 %v1646_v11, 0.0  ;;  %1816 = vmatmul.msk.f32.gmra.mxu0 %vm73_vm1, %v64_v9  ;;  %1915 = vmatmul.msk.f32.gmra.mxu1 %vm73_vm1, %v1865_v10  ;;  %v69_v10 = vld [vmem:[%s3214_s0 + $0x168] sm:$0xff]  ;;  %v1870_v11 = vld [vmem:[%s3214_s0 + $0x2f0] sm:$0xff] }
 0x158   :  { %v1085_v14 = vpop.f32.mrf.mxu2  ;;  %v1495_v15 = vpop.f32.mrf.mxu3 }
 0x159   :  { %1745 = vst.msk [vmem:[%s3216_s3 + $0xb8] sm:$0xff] %vm1721_vm2, %v1695_v13  ;;  %v1184_v16 = vmax.f32 %v774_v12, %v1085_v14  ;;  %v3054_v12 = vld [vmem:[%s3215_s2] ss:$0 sm:$0xff] }
 0x15b   :  { %v1594_v19 = vmax.f32 %v1184_v16, %v1495_v15 }
 0x15c   :  { %v317_v21 = vpop.f32.mrf.mxu0  ;;  %v678_v22 = vpop.f32.mrf.mxu1 }
 0x15d   :  { %v1647_v25 = vadd.f32 %v2449_v20, %v1594_v19  ;;  %2015 = vmatmul.msk.f32.gmra.mxu2 %vm73_vm1, %v1965_v17  ;;  %v775_v26 = vmax.f32 %v317_v21, %v678_v22  ;;  %2114 = vmatmul.msk.f32.gmra.mxu3 %vm73_vm1, %v2064_v18  ;;  %v1970_v19 = vld [vmem:[%s3214_s0 + $0x480] sm:$0xff]  ;;  %v2069_v21 = vld [vmem:[%s3214_s0 + $0x608] sm:$0xff] }
 0x15f   :  { %v1696_v27 = vmax.f32 %v1647_v25, 0.0  ;;  %1817 = vmatmul.msk.f32.gmra.mxu0 %vm73_vm1, %v65_v23  ;;  %1916 = vmatmul.msk.f32.gmra.mxu1 %vm73_vm1, %v1866_v24  ;;  %v70_v25 = vld [vmem:[%s3214_s0 + $0x170] sm:$0xff] }
 0x160   :  { %v1088_v28 = vpop.f32.mrf.mxu2  ;;  %v1498_v29 = vpop.f32.mrf.mxu3 }
 0x161   :  { %1746 = vst.msk [vmem:[%s3216_s3 + $0xc0] sm:$0xff] %vm1721_vm2, %v1696_v27  ;;  %v1185_v30 = vmax.f32 %v775_v26, %v1088_v28  ;;  %v1871_v26 = vld [vmem:[%s3214_s0 + $0x2f8] sm:$0xff] }
 0x163   :  { %v1595_v33 = vmax.f32 %v1185_v30, %v1498_v29 }
 0x164   :  { %v320_v34 = vpop.f32.mrf.mxu0  ;;  %v681_v35 = vpop.f32.mrf.mxu1 }
 0x165   :  { %v1648_v38 = vadd.f32 %v2449_v20, %v1595_v33  ;;  %2016 = vmatmul.msk.f32.gmra.mxu2 %vm73_vm1, %v1966_v31  ;;  %v776_v39 = vmax.f32 %v320_v34, %v681_v35  ;;  %2115 = vmatmul.msk.f32.gmra.mxu3 %vm73_vm1, %v2065_v32  ;;  %v1971_v33 = vld [vmem:[%s3214_s0 + $0x488] sm:$0xff]  ;;  %v2070_v34 = vld [vmem:[%s3214_s0 + $0x610] sm:$0xff] }
 0x167   :  { %v1697_v40 = vmax.f32 %v1648_v38, 0.0  ;;  %1818 = vmatmul.msk.f32.gmra.mxu0 %vm73_vm1, %v66_v36  ;;  %1917 = vmatmul.msk.f32.gmra.mxu1 %vm73_vm1, %v1867_v37  ;;  %v71_v38 = vld [vmem:[%s3214_s0 + $0x178] sm:$0xff] }
 0x168   :  { %v1091_v41 = vpop.f32.mrf.mxu2  ;;  %v1501_v42 = vpop.f32.mrf.mxu3 }
 0x169   :  { %1747 = vst.msk [vmem:[%s3216_s3 + $0xc8] sm:$0xff] %vm1721_vm2, %v1697_v40  ;;  %v1186_v43 = vmax.f32 %v776_v39, %v1091_v41  ;;  %v1872_v39 = vld [vmem:[%s3214_s0 + $0x300] sm:$0xff] }
 0x16b   :  { %v1596_v46 = vmax.f32 %v1186_v43, %v1501_v42 }
 0x16c   :  { %v323_v47 = vpop.f32.mrf.mxu0  ;;  %v684_v48 = vpop.f32.mrf.mxu1 }
 0x16d   :  { %v1649_v51 = vadd.f32 %v2449_v20, %v1596_v46  ;;  %2017 = vmatmul.msk.f32.gmra.mxu2 %vm73_vm1, %v1967_v44  ;;  %v777_v52 = vmax.f32 %v323_v47, %v684_v48  ;;  %2116 = vmatmul.msk.f32.gmra.mxu3 %vm73_vm1, %v2066_v45  ;;  %v1972_v46 = vld [vmem:[%s3214_s0 + $0x490] sm:$0xff]  ;;  %v2071_v47 = vld [vmem:[%s3214_s0 + $0x618] sm:$0xff] }
 0x16f   :  { %v1698_v53 = vmax.f32 %v1649_v51, 0.0  ;;  %1819 = vmatmul.msk.f32.gmra.mxu0 %vm73_vm1, %v67_v49  ;;  %1918 = vmatmul.msk.f32.gmra.mxu1 %vm73_vm1, %v1868_v50  ;;  %v72_v51 = vld [vmem:[%s3214_s0 + $0x180] sm:$0xff] }
 0x170   :  { %v1094_v54 = vpop.f32.mrf.mxu2  ;;  %v1504_v55 = vpop.f32.mrf.mxu3 }
 0x171   :  { %1748 = vst.msk [vmem:[%s3216_s3 + $0xd0] sm:$0xff] %vm1721_vm2, %v1698_v53  ;;  %v1187_v56 = vmax.f32 %v777_v52, %v1094_v54  ;;  %v1873_v52 = vld [vmem:[%s3214_s0 + $0x308] sm:$0xff] }
 0x173   :  { %v1597_v59 = vmax.f32 %v1187_v56, %v1504_v55 }
 0x174   :  { %v326_v60 = vpop.f32.mrf.mxu0  ;;  %v687_v61 = vpop.f32.mrf.mxu1 }
 0x175   :  { %v1650_v0 = vadd.f32 %v2449_v20, %v1597_v59  ;;  %2018 = vmatmul.msk.f32.gmra.mxu2 %vm73_vm1, %v1968_v57  ;;  %v778_v1 = vmax.f32 %v326_v60, %v687_v61  ;;  %2117 = vmatmul.msk.f32.gmra.mxu3 %vm73_vm1, %v2067_v58  ;;  %v1969_v20 = vld [vmem:[%s3214_s0 + $0x478] sm:$0xff] }
 0x177   :  { %v1699_v2 = vmax.f32 %v1650_v0, 0.0  ;;  %1820 = vmatmul.msk.f32.gmra.mxu0 %vm73_vm1, %v68_v62  ;;  %1919 = vmatmul.msk.f32.gmra.mxu1 %vm73_vm1, %v1869_v63 }
 0x178   :  { %v1097_v3 = vpop.f32.mrf.mxu2  ;;  %v1507_v4 = vpop.f32.mrf.mxu3 }
 0x179   :  { %1749 = vst.msk [vmem:[%s3216_s3 + $0xd8] sm:$0xff] %vm1721_vm2, %v1699_v2  ;;  %v1188_v5 = vmax.f32 %v778_v1, %v1097_v3 }
 0x17b   :  { %v1598_v7 = vmax.f32 %v1188_v5, %v1507_v4 }
 0x17c   :  { %v329_v8 = vpop.f32.mrf.mxu0  ;;  %v690_v9 = vpop.f32.mrf.mxu1 }
 0x17d   :  { %v1651_v13 = vadd.f32 %v3054_v12, %v1598_v7  ;;  %2019 = vmatmul.msk.f32.gmra.mxu2 %vm73_vm1, %v1969_v20  ;;  %v779_v14 = vmax.f32 %v329_v8, %v690_v9  ;;  %2118 = vmatmul.msk.f32.gmra.mxu3 %vm73_vm1, %v2068_v6 }
 0x17f   :  { %v1700_v15 = vmax.f32 %v1651_v13, 0.0  ;;  %1821 = vmatmul.msk.f32.gmra.mxu0 %vm73_vm1, %v69_v10  ;;  %1920 = vmatmul.msk.f32.gmra.mxu1 %vm73_vm1, %v1870_v11 }
 0x180   :  { %v1100_v16 = vpop.f32.mrf.mxu2  ;;  %v1510_v17 = vpop.f32.mrf.mxu3 }
 0x181   :  { %1750 = vst.msk [vmem:[%s3216_s3 + $0xe0] sm:$0xff] %vm1721_vm2, %v1700_v15  ;;  %v1189_v18 = vmax.f32 %v779_v14, %v1100_v16 }
 0x183   :  { %v1599_v22 = vmax.f32 %v1189_v18, %v1510_v17 }
 0x184   :  { %v332_v23 = vpop.f32.mrf.mxu0  ;;  %v693_v24 = vpop.f32.mrf.mxu1 }
 0x185   :  { %v1652_v27 = vadd.f32 %v3054_v12, %v1599_v22  ;;  %2020 = vmatmul.msk.f32.gmra.mxu2 %vm73_vm1, %v1970_v19  ;;  %v780_v28 = vmax.f32 %v332_v23, %v693_v24  ;;  %2119 = vmatmul.msk.f32.gmra.mxu3 %vm73_vm1, %v2069_v21 }
 0x187   :  { %v1701_v29 = vmax.f32 %v1652_v27, 0.0  ;;  %1822 = vmatmul.msk.f32.gmra.mxu0 %vm73_vm1, %v70_v25  ;;  %1921 = vmatmul.msk.f32.gmra.mxu1 %vm73_vm1, %v1871_v26 }
 0x188   :  { %v1103_v30 = vpop.f32.mrf.mxu2  ;;  %v1513_v31 = vpop.f32.mrf.mxu3 }
 0x189   :  { %1751 = vst.msk [vmem:[%s3216_s3 + $0xe8] sm:$0xff] %vm1721_vm2, %v1701_v29  ;;  %v1190_v32 = vmax.f32 %v780_v28, %v1103_v30 }
 0x18b   :  { %v1600_v35 = vmax.f32 %v1190_v32, %v1513_v31 }
 0x18c   :  { %v335_v36 = vpop.f32.mrf.mxu0  ;;  %v696_v37 = vpop.f32.mrf.mxu1 }
 0x18d   :  { %v1653_v40 = vadd.f32 %v3054_v12, %v1600_v35  ;;  %2021 = vmatmul.msk.f32.gmra.mxu2 %vm73_vm1, %v1971_v33  ;;  %v781_v41 = vmax.f32 %v335_v36, %v696_v37  ;;  %2120 = vmatmul.msk.f32.gmra.mxu3 %vm73_vm1, %v2070_v34 }
 0x18f   :  { %v1702_v42 = vmax.f32 %v1653_v40, 0.0  ;;  %1823 = vmatmul.msk.f32.gmra.mxu0 %vm73_vm1, %v71_v38  ;;  %1922 = vmatmul.msk.f32.gmra.mxu1 %vm73_vm1, %v1872_v39 }
 0x190   :  { %v1106_v43 = vpop.f32.mrf.mxu2  ;;  %v1516_v44 = vpop.f32.mrf.mxu3 }
 0x191   :  { %1752 = vst.msk [vmem:[%s3216_s3 + $0xf0] sm:$0xff] %vm1721_vm2, %v1702_v42  ;;  %v1191_v45 = vmax.f32 %v781_v41, %v1106_v43 }
 0x193   :  { %v1601_v48 = vmax.f32 %v1191_v45, %v1516_v44 }
 0x194   :  { %v338_v49 = vpop.f32.mrf.mxu0  ;;  %v699_v50 = vpop.f32.mrf.mxu1 }
 0x195   :  { %v1654_v53 = vadd.f32 %v3054_v12, %v1601_v48  ;;  %2022 = vmatmul.msk.f32.gmra.mxu2 %vm73_vm1, %v1972_v46  ;;  %v782_v54 = vmax.f32 %v338_v49, %v699_v50  ;;  %2121 = vmatmul.msk.f32.gmra.mxu3 %vm73_vm1, %v2071_v47 }
 0x197   :  { %v1703_v55 = vmax.f32 %v1654_v53, 0.0  ;;  %1824 = vmatmul.msk.f32.gmra.mxu0 %vm73_vm1, %v72_v51  ;;  %1923 = vmatmul.msk.f32.gmra.mxu1 %vm73_vm1, %v1873_v52 }
 0x198   :  { %v1109_v56 = vpop.f32.mrf.mxu2  ;;  %v1519_v57 = vpop.f32.mrf.mxu3 }
 0x199   :  { %1753 = vst.msk [vmem:[%s3216_s3 + $0xf8] sm:$0xff] %vm1721_vm2, %v1703_v55  ;;  %v1192_v58 = vmax.f32 %v782_v54, %v1109_v56 }
 0x19b   :  { %v1602_v59 = vmax.f32 %v1192_v58, %v1519_v57 }
 0x19c   :  { %v341_v60 = vpop.f32.mrf.mxu0  ;;  %v702_v61 = vpop.f32.mrf.mxu1 }
 0x19d   :  { %v1655_v62 = vadd.f32 %v3054_v12, %v1602_v59  ;;  %v783_v63 = vmax.f32 %v341_v60, %v702_v61 }
 0x19f   :  { %v1704_v0 = vmax.f32 %v1655_v62, 0.0 }
 0x1a0   :  { %v1112_v1 = vpop.f32.mrf.mxu2  ;;  %v1522_v2 = vpop.f32.mrf.mxu3 }
 0x1a1   :  { %1754 = vst.msk [vmem:[%s3216_s3 + $0x100] sm:$0xff] %vm1721_vm2, %v1704_v0  ;;  %v1193_v3 = vmax.f32 %v783_v63, %v1112_v1 }
 0x1a3   :  { %v1603_v4 = vmax.f32 %v1193_v3, %v1522_v2 }
 0x1a4   :  { %v344_v5 = vpop.f32.mrf.mxu0  ;;  %v705_v20 = vpop.f32.mrf.mxu1 }
 0x1a5   :  { %v1656_v6 = vadd.f32 %v3054_v12, %v1603_v4  ;;  %v784_v7 = vmax.f32 %v344_v5, %v705_v20 }
 0x1a7   :  { %v1705_v8 = vmax.f32 %v1656_v6, 0.0 }
 0x1a8   :  { %v1115_v9 = vpop.f32.mrf.mxu2  ;;  %v1525_v10 = vpop.f32.mrf.mxu3 }
 0x1a9   :  { %1755 = vst.msk [vmem:[%s3216_s3 + $0x108] sm:$0xff] %vm1721_vm2, %v1705_v8  ;;  %v1194_v11 = vmax.f32 %v784_v7, %v1115_v9 }
 0x1ab   :  { %v1604_v13 = vmax.f32 %v1194_v11, %v1525_v10 }
 0x1ac   :  { %v347_v14 = vpop.f32.mrf.mxu0  ;;  %v708_v15 = vpop.f32.mrf.mxu1 }
 0x1ad   :  { %v1657_v16 = vadd.f32 %v3054_v12, %v1604_v13  ;;  %v785_v17 = vmax.f32 %v347_v14, %v708_v15 }
 0x1af   :  { %v1706_v18 = vmax.f32 %v1657_v16, 0.0 }
 0x1b0   :  { %v1118_v19 = vpop.f32.mrf.mxu2  ;;  %v1528_v21 = vpop.f32.mrf.mxu3 }
 0x1b1   :  { %1756 = vst.msk [vmem:[%s3216_s3 + $0x110] sm:$0xff] %vm1721_vm2, %v1706_v18  ;;  %v1195_v22 = vmax.f32 %v785_v17, %v1118_v19 }
 0x1b3   :  { %v1605_v23 = vmax.f32 %v1195_v22, %v1528_v21 }
 0x1b4   :  { %v350_v24 = vpop.f32.mrf.mxu0  ;;  %v711_v25 = vpop.f32.mrf.mxu1 }
 0x1b5   :  { %v1658_v26 = vadd.f32 %v3054_v12, %v1605_v23  ;;  %v786_v27 = vmax.f32 %v350_v24, %v711_v25 }
 0x1b7   :  { %v1707_v28 = vmax.f32 %v1658_v26, 0.0 }
 0x1b8   :  { %v1121_v29 = vpop.f32.mrf.mxu2  ;;  %v1531_v30 = vpop.f32.mrf.mxu3 }
 0x1b9   :  { %1757 = vst.msk [vmem:[%s3216_s3 + $0x118] sm:$0xff] %vm1721_vm2, %v1707_v28  ;;  %v1196_v31 = vmax.f32 %v786_v27, %v1121_v29 }
 0x1bb   :  { %v1606_v32 = vmax.f32 %v1196_v31, %v1531_v30 }
 0x1bc   :  { %v353_v33 = vpop.f32.mrf.mxu0  ;;  %v714_v34 = vpop.f32.mrf.mxu1 }
 0x1bd   :  { %v1659_v35 = vadd.f32 %v3054_v12, %v1606_v32  ;;  %v787_v36 = vmax.f32 %v353_v33, %v714_v34 }
 0x1bf   :  { %v1708_v37 = vmax.f32 %v1659_v35, 0.0 }
 0x1c0   :  { %v1124_v38 = vpop.f32.mrf.mxu2  ;;  %v1534_v39 = vpop.f32.mrf.mxu3 }
 0x1c1   :  { %1758 = vst.msk [vmem:[%s3216_s3 + $0x120] sm:$0xff] %vm1721_vm2, %v1708_v37  ;;  %v1197_v40 = vmax.f32 %v787_v36, %v1124_v38 }
 0x1c3   :  { %v1607_v41 = vmax.f32 %v1197_v40, %v1534_v39 }
 0x1c4   :  { %v356_v42 = vpop.f32.mrf.mxu0  ;;  %v717_v43 = vpop.f32.mrf.mxu1 }
 0x1c5   :  { %v1660_v44 = vadd.f32 %v3054_v12, %v1607_v41  ;;  %v788_v45 = vmax.f32 %v356_v42, %v717_v43 }
 0x1c7   :  { %v1709_v46 = vmax.f32 %v1660_v44, 0.0 }
 0x1c8   :  { %v1127_v47 = vpop.f32.mrf.mxu2  ;;  %v1537_v48 = vpop.f32.mrf.mxu3 }
 0x1c9   :  { %1759 = vst.msk [vmem:[%s3216_s3 + $0x128] sm:$0xff] %vm1721_vm2, %v1709_v46  ;;  %v1198_v49 = vmax.f32 %v788_v45, %v1127_v47 }
 0x1cb   :  { %v1608_v50 = vmax.f32 %v1198_v49, %v1537_v48 }
 0x1cc   :  { %v359_v51 = vpop.f32.mrf.mxu0  ;;  %v720_v52 = vpop.f32.mrf.mxu1 }
 0x1cd   :  { %v1661_v53 = vadd.f32 %v3054_v12, %v1608_v50  ;;  %v789_v54 = vmax.f32 %v359_v51, %v720_v52 }
 0x1cf   :  { %v1710_v55 = vmax.f32 %v1661_v53, 0.0 }
 0x1d0   :  { %v1130_v56 = vpop.f32.mrf.mxu2  ;;  %v1540_v57 = vpop.f32.mrf.mxu3 }
 0x1d1   :  { %1760 = vst.msk [vmem:[%s3216_s3 + $0x130] sm:$0xff] %vm1721_vm2, %v1710_v55  ;;  %v1199_v58 = vmax.f32 %v789_v54, %v1130_v56 }
 0x1d3   :  { %v1609_v59 = vmax.f32 %v1199_v58, %v1540_v57 }
 0x1d4   :  { %v362_v60 = vpop.f32.mrf.mxu0  ;;  %v723_v61 = vpop.f32.mrf.mxu1 }
 0x1d5   :  { %v1662_v62 = vadd.f32 %v3054_v12, %v1609_v59  ;;  %v790_v63 = vmax.f32 %v362_v60, %v723_v61 }
 0x1d7   :  { %v1711_v0 = vmax.f32 %v1662_v62, 0.0 }
 0x1d8   :  { %v1133_v1 = vpop.f32.mrf.mxu2  ;;  %v1543_v2 = vpop.f32.mrf.mxu3 }
 0x1d9   :  { %1761 = vst.msk [vmem:[%s3216_s3 + $0x138] sm:$0xff] %vm1721_vm2, %v1711_v0  ;;  %v1200_v3 = vmax.f32 %v790_v63, %v1133_v1 }
 0x1db   :  { %v1610_v4 = vmax.f32 %v1200_v3, %v1543_v2 }
 0x1dc   :  { %v365_v5 = vpop.f32.mrf.mxu0  ;;  %v726_v20 = vpop.f32.mrf.mxu1 }
 0x1dd   :  { %v1663_v6 = vadd.f32 %v3054_v12, %v1610_v4  ;;  %v791_v7 = vmax.f32 %v365_v5, %v726_v20 }
 0x1df   :  { %v1712_v8 = vmax.f32 %v1663_v6, 0.0 }
 0x1e0   :  { %v1136_v9 = vpop.f32.mrf.mxu2  ;;  %v1546_v10 = vpop.f32.mrf.mxu3 }
 0x1e1   :  { %1762 = vst.msk [vmem:[%s3216_s3 + $0x140] sm:$0xff] %vm1721_vm2, %v1712_v8  ;;  %v1201_v11 = vmax.f32 %v791_v7, %v1136_v9 }
 0x1e3   :  { %v1611_v13 = vmax.f32 %v1201_v11, %v1546_v10 }
 0x1e4   :  { %v368_v14 = vpop.f32.mrf.mxu0  ;;  %v729_v15 = vpop.f32.mrf.mxu1 }
 0x1e5   :  { %v1664_v16 = vadd.f32 %v3054_v12, %v1611_v13  ;;  %v792_v17 = vmax.f32 %v368_v14, %v729_v15 }
 0x1e7   :  { %v1713_v18 = vmax.f32 %v1664_v16, 0.0 }
 0x1e8   :  { %v1139_v19 = vpop.f32.mrf.mxu2  ;;  %v1549_v21 = vpop.f32.mrf.mxu3 }
 0x1e9   :  { %1763 = vst.msk [vmem:[%s3216_s3 + $0x148] sm:$0xff] %vm1721_vm2, %v1713_v18  ;;  %v1202_v22 = vmax.f32 %v792_v17, %v1139_v19 }
 0x1eb   :  { %v1612_v23 = vmax.f32 %v1202_v22, %v1549_v21 }
 0x1ec   :  { %v371_v24 = vpop.f32.mrf.mxu0  ;;  %v732_v25 = vpop.f32.mrf.mxu1 }
 0x1ed   :  { %v1665_v26 = vadd.f32 %v3054_v12, %v1612_v23  ;;  %v793_v27 = vmax.f32 %v371_v24, %v732_v25 }
 0x1ef   :  { %v1714_v28 = vmax.f32 %v1665_v26, 0.0 }
 0x1f0   :  { %v1142_v29 = vpop.f32.mrf.mxu2  ;;  %v1552_v30 = vpop.f32.mrf.mxu3 }
 0x1f1   :  { %1764 = vst.msk [vmem:[%s3216_s3 + $0x150] sm:$0xff] %vm1721_vm2, %v1714_v28  ;;  %v1203_v31 = vmax.f32 %v793_v27, %v1142_v29 }
 0x1f3   :  { %v1613_v32 = vmax.f32 %v1203_v31, %v1552_v30 }
 0x1f4   :  { %v374_v33 = vpop.f32.mrf.mxu0  ;;  %v735_v34 = vpop.f32.mrf.mxu1 }
 0x1f5   :  { %v1666_v35 = vadd.f32 %v3054_v12, %v1613_v32  ;;  %v794_v36 = vmax.f32 %v374_v33, %v735_v34 }
 0x1f7   :  { %v1715_v37 = vmax.f32 %v1666_v35, 0.0 }
 0x1f8   :  { %v1145_v38 = vpop.f32.mrf.mxu2  ;;  %v1555_v39 = vpop.f32.mrf.mxu3 }
 0x1f9   :  { %1765 = vst.msk [vmem:[%s3216_s3 + $0x158] sm:$0xff] %vm1721_vm2, %v1715_v37  ;;  %v1204_v40 = vmax.f32 %v794_v36, %v1145_v38 }
 0x1fb   :  { %v1614_v41 = vmax.f32 %v1204_v40, %v1555_v39 }
 0x1fc   :  { %v377_v42 = vpop.f32.mrf.mxu0  ;;  %v738_v43 = vpop.f32.mrf.mxu1 }
 0x1fd   :  { %v1667_v44 = vadd.f32 %v3054_v12, %v1614_v41  ;;  %v795_v45 = vmax.f32 %v377_v42, %v738_v43 }
 0x1ff   :  { %v1716_v46 = vmax.f32 %v1667_v44, 0.0 }
 0x200   :  { %v1148_v47 = vpop.f32.mrf.mxu2  ;;  %v1558_v48 = vpop.f32.mrf.mxu3 }
 0x201   :  { %1766 = vst.msk [vmem:[%s3216_s3 + $0x160] sm:$0xff] %vm1721_vm2, %v1716_v46  ;;  %v1205_v49 = vmax.f32 %v795_v45, %v1148_v47 }
 0x203   :  { %v1615_v50 = vmax.f32 %v1205_v49, %v1558_v48 }
 0x204   :  { %v380_v51 = vpop.f32.mrf.mxu0  ;;  %v741_v52 = vpop.f32.mrf.mxu1 }
 0x205   :  { %v1668_v53 = vadd.f32 %v3054_v12, %v1615_v50  ;;  %v796_v54 = vmax.f32 %v380_v51, %v741_v52 }
 0x207   :  { %v1717_v55 = vmax.f32 %v1668_v53, 0.0 }
 0x208   :  { %v1151_v56 = vpop.f32.mrf.mxu2  ;;  %v1561_v57 = vpop.f32.mrf.mxu3 }
 0x209   :  { %1767 = vst.msk [vmem:[%s3216_s3 + $0x168] sm:$0xff] %vm1721_vm2, %v1717_v55  ;;  %v1206_v58 = vmax.f32 %v796_v54, %v1151_v56 }
 0x20b   :  { %v1616_v59 = vmax.f32 %v1206_v58, %v1561_v57 }
 0x20c   :  { %v383_v60 = vpop.f32.mrf.mxu0  ;;  %v744_v61 = vpop.f32.mrf.mxu1 }
 0x20d   :  { %v1669_v62 = vadd.f32 %v3054_v12, %v1616_v59  ;;  %v797_v63 = vmax.f32 %v383_v60, %v744_v61 }
 0x20f   :  { %v1718_v0 = vmax.f32 %v1669_v62, 0.0 }
 0x210   :  { %v1154_v1 = vpop.f32.mrf.mxu2  ;;  %v1564_v2 = vpop.f32.mrf.mxu3 }
 0x211   :  { %1768 = vst.msk [vmem:[%s3216_s3 + $0x170] sm:$0xff] %vm1721_vm2, %v1718_v0  ;;  %v1207_v3 = vmax.f32 %v797_v63, %v1154_v1 }
 0x213   :  { %v1617_v4 = vmax.f32 %v1207_v3, %v1564_v2 }
 0x214   :  { %v386_v5 = vpop.f32.mrf.mxu0  ;;  %v747_v20 = vpop.f32.mrf.mxu1 }
 0x215   :  { %v1670_v6 = vadd.f32 %v3054_v12, %v1617_v4  ;;  %v798_v7 = vmax.f32 %v386_v5, %v747_v20 }
 0x217   :  { %v1719_v8 = vmax.f32 %v1670_v6, 0.0 }
 0x218   :  { %v1157_v9 = vpop.f32.mrf.mxu2  ;;  %v1567_v10 = vpop.f32.mrf.mxu3 }
 0x219   :  { %1769 = vst.msk [vmem:[%s3216_s3 + $0x178] sm:$0xff] %vm1721_vm2, %v1719_v8  ;;  %v1208_v11 = vmax.f32 %v798_v7, %v1157_v9 }
 0x21b   :  { %v1618_v13 = vmax.f32 %v1208_v11, %v1567_v10 }
 0x21d   :  { %v1671_v14 = vadd.f32 %v3054_v12, %v1618_v13 }
 0x21f   :  { %v1720_v15 = vmax.f32 %v1671_v14, 0.0 }
 0x221   :  { %1770 = vst.msk [vmem:[%s3216_s3 + $0x180] sm:$0xff] %vm1721_vm2, %v1720_v15 }

// kernel: forward.4
= control target key start
LH: loop header
LB: loop body
LE: loop exit
PB: predicated region body
PF: predicated region fallthrough
CT: control target
= control target key end

     0   :  { %vm69_vm0 = vcmask 1045504   ;;  %vm47_vm1 = vcmask 179200   ;;  %vm524_vm2 = vcmask 130048   ;;  %vm531_vm3 = vcmask 123904   ;;  %s1108_s1 = inlined_call_operand.vmem [shape: f32[150,16], index: 1, kind: input, shape index: {}]   ;;  %s1109_s0 = inlined_call_operand.vmem [shape: f32[4,50,150], index: 0, kind: input, shape index: {}]   ;;  %s1110_s2 = inlined_call_operand.vmem [shape: f32[1,16], index: 2, kind: input, shape index: {}]   ;;  %s1111_s3 = inlined_call_operand.vmem [shape: f32[50,16], index: 3, kind: output, shape index: {}]  }
   0x1   :  { %v654_v0 = vld [vmem:[%s1108_s1 + $0x78] sm:$0xff]  ;;  %v659_v1 = vld [vmem:[%s1108_s1 + $0x90] sm:$0x3f]  ;;  %v671_v3 = vld [vmem:[%s1108_s1 + $0x88] sm:$0xff] }
   0x2   :  { %v664_v2 = vld [vmem:[%s1108_s1 + $0x70] sm:$0xff]  ;;  %73 = vmatpush.msra.mxu0 %v654_v0  ;;  %185 = vmatpush.msra.mxu2 %v654_v0  ;;  %v678_v4 = vld [vmem:[%s1108_s1 + $0x68] sm:$0xff]  ;;  %v687_v5 = vld [vmem:[%s1108_s1 + $0x80] sm:$0xff] }
   0x3   :  { %559 = vmatpush.msk.msra.mxu3 %vm69_vm0, %v659_v1  ;;  %537 = vmatpush.msk.msra.mxu1 %vm69_vm0, %v659_v1  ;;  %v546_v6 = vld [vmem:[%s1109_s0 + $0x78] sm:$0xff]  ;;  %v696_v7 = vld [vmem:[%s1108_s1 + $0x60] sm:$0xff]  ;;  %v34_v8 = vld [vmem:[%s1109_s0 + $0x8] sm:$0xff] }
   0x4   :  { %74 = vmatpush.msra.mxu0 %v664_v2  ;;  %186 = vmatpush.msra.mxu2 %v664_v2  ;;  %v708_v9 = vld [vmem:[%s1108_s1 + $0x58] sm:$0xff]  ;;  %v717_v10 = vld [vmem:[%s1108_s1 + $0x50] sm:$0xff]  ;;  %v727_v11 = vld [vmem:[%s1108_s1 + $0x48] sm:$0xff] }
   0x5   :  { %237 = vmatpush.msra.mxu3 %v671_v3  ;;  %125 = vmatpush.msra.mxu1 %v671_v3  ;;  %v548_v12 = vld [vmem:[%s1109_s0 + $0x88] sm:$0xff]  ;;  %v739_v13 = vld [vmem:[%s1108_s1 + $0x40] sm:$0xff]  ;;  %v36_v14 = vld [vmem:[%s1109_s0 + $0x18] sm:$0xff] }
   0x6   :  { %75 = vmatpush.msra.mxu0 %v678_v4  ;;  %187 = vmatpush.msra.mxu2 %v678_v4  ;;  %v751_v15 = vld [vmem:[%s1108_s1 + $0x38] sm:$0xff]  ;;  %v760_v16 = vld [vmem:[%s1108_s1 + $0x30] sm:$0xff]  ;;  %v769_v17 = vld [vmem:[%s1108_s1 + $0x28] sm:$0xff] }
   0x7   :  { %238 = vmatpush.msra.mxu3 %v687_v5  ;;  %126 = vmatpush.msra.mxu1 %v687_v5  ;;  %v550_v18 = vld [vmem:[%s1109_s0 + $0x98] sm:$0xff]  ;;  %v782_v19 = vld [vmem:[%s1108_s1 + $0x20] sm:$0xff]  ;;  %v38_v20 = vld [vmem:[%s1109_s0 + $0x28] sm:$0xff] }
   0x8   :  { %560 = vmatmul.msk.f32.vlgmr.msra.gmra.mxu3 %vm47_vm1, %v546_v6  ;;  %76 = vmatpush.msra.mxu0 %v696_v7  ;;  %v794_v21 = vld [vmem:[%s1108_s1 + $0x18] sm:$0xff]  ;;  %v803_v22 = vld [vmem:[%s1108_s1 + $0x10] sm:$0xff]  ;;  %v812_v23 = vld [vmem:[%s1108_s1 + $0x8] sm:$0xff] }
   0x9   :  { %188 = vmatpush.msra.mxu2 %v696_v7  ;;  %538 = vmatmul.msk.f32.vlgmr.msra.gmra.mxu1 %vm47_vm1, %v34_v8  ;;  %v552_v24 = vld [vmem:[%s1109_s0 + $0xa8] sm:$0xff]  ;;  %v823_v25 = vld [vmem:[%s1108_s1] sm:$0xff]  ;;  %v545_v27 = vld [vmem:[%s1109_s0 + $0x70] sm:$0xff] }
   0xa   :  { %77 = vmatpush.msra.mxu0 %v708_v9  ;;  %581 = vmatpush.msk.msrb.mxu3 %vm69_vm0, %v659_v1  ;;  %v33_v26 = vld [vmem:[%s1109_s0] sm:$0xff]  ;;  %v40_v28 = vld [vmem:[%s1109_s0 + $0x38] sm:$0xff]  ;;  %v35_v30 = vld [vmem:[%s1109_s0 + $0x10] sm:$0xff] }
   0xb   :  { %189 = vmatpush.msra.mxu2 %v708_v9  ;;  %304 = vmatpush.msrb.mxu1 %v654_v0  ;;  %v554_v29 = vld [vmem:[%s1109_s0 + $0xb8] sm:$0xff]  ;;  %v547_v31 = vld [vmem:[%s1109_s0 + $0x80] sm:$0xff]  ;;  %v42_v32 = vld [vmem:[%s1109_s0 + $0x48] sm:$0xff] }
   0xc   :  { %78 = vmatpush.msra.mxu0 %v717_v10  ;;  %356 = vmatpush.msrb.mxu3 %v671_v3  ;;  %v556_v33 = vld [vmem:[%s1109_s0 + $0xc8] sm:$0xff]  ;;  %v37_v34 = vld [vmem:[%s1109_s0 + $0x20] sm:$0xff]  ;;  %v549_v35 = vld [vmem:[%s1109_s0 + $0x90] sm:$0xff] }
   0xd   :  { %190 = vmatpush.msra.mxu2 %v717_v10  ;;  %305 = vmatpush.msrb.mxu1 %v664_v2  ;;  %v44_v36 = vld [vmem:[%s1109_s0 + $0x58] sm:$0xff]  ;;  %v39_v38 = vld [vmem:[%s1109_s0 + $0x30] sm:$0xff]  ;;  %v551_v39 = vld [vmem:[%s1109_s0 + $0xa0] sm:$0xff] }
   0xe   :  { %79 = vmatpush.msra.mxu0 %v727_v11  ;;  %357 = vmatpush.msrb.mxu3 %v687_v5  ;;  %v558_v37 = vld [vmem:[%s1109_s0 + $0xd8] sm:$0x3]  ;;  %v46_v40 = vld [vmem:[%s1109_s0 + $0x68] sm:$0x3]  ;;  %v41_v42 = vld [vmem:[%s1109_s0 + $0x40] sm:$0xff] }
   0xf   :  { %191 = vmatpush.msra.mxu2 %v727_v11  ;;  %306 = vmatpush.msrb.mxu1 %v678_v4  ;;  %v568_v41 = vld [vmem:[%s1109_s0 + $0xe8] sm:$0xff]  ;;  %v553_v43 = vld [vmem:[%s1109_s0 + $0xb0] sm:$0xff]  ;;  %v567_v44 = vld [vmem:[%s1109_s0 + $0xe0] sm:$0xff] }
  0x10   :  { %561 = vmatmul.msk.f32.gmra.mxu3 %vm47_vm1, %v548_v12  ;;  %80 = vmatpush.msra.mxu0 %v739_v13  ;;  %v570_v45 = vld [vmem:[%s1109_s0 + $0xf8] sm:$0xff]  ;;  %v43_v46 = vld [vmem:[%s1109_s0 + $0x50] sm:$0xff]  ;;  %v555_v47 = vld [vmem:[%s1109_s0 + $0xc0] sm:$0xff] }
  0x11   :  { %192 = vmatpush.msra.mxu2 %v739_v13  ;;  %539 = vmatmul.msk.f32.gmra.mxu1 %vm47_vm1, %v36_v14  ;;  %v569_v48 = vld [vmem:[%s1109_s0 + $0xf0] sm:$0xff]  ;;  %v572_v49 = vld [vmem:[%s1109_s0 + $0x108] sm:$0xff]  ;;  %v45_v50 = vld [vmem:[%s1109_s0 + $0x60] sm:$0x3] }
  0x12   :  { %81 = vmatpush.msra.mxu0 %v751_v15  ;;  %307 = vmatpush.msrb.mxu1 %v696_v7  ;;  %v557_v51 = vld [vmem:[%s1109_s0 + $0xd0] sm:$0x3]  ;;  %v571_v52 = vld [vmem:[%s1109_s0 + $0x100] sm:$0xff]  ;;  %v574_v53 = vld [vmem:[%s1109_s0 + $0x118] sm:$0xff] }
  0x13   :  { %193 = vmatpush.msra.mxu2 %v751_v15  ;;  %627 = vmatpush.msk.msra.mxu3 %vm69_vm0, %v659_v1  ;;  %v589_v54 = vld [vmem:[%s1109_s0 + $0x150] sm:$0xff]  ;;  %v590_v55 = vld [vmem:[%s1109_s0 + $0x158] sm:$0xff]  ;;  %v576_v57 = vld [vmem:[%s1109_s0 + $0x128] sm:$0xff] }
  0x14   :  { %82 = vmatpush.msra.mxu0 %v760_v16  ;;  %308 = vmatpush.msrb.mxu1 %v708_v9  ;;  %v573_v56 = vld [vmem:[%s1109_s0 + $0x110] sm:$0xff]  ;;  %v591_v58 = vld [vmem:[%s1109_s0 + $0x160] sm:$0xff]  ;;  %v592_v59 = vld [vmem:[%s1109_s0 + $0x168] sm:$0xff] }
  0x15   :  { %194 = vmatpush.msra.mxu2 %v760_v16  ;;  %628 = vmatpush.msra.mxu3 %v671_v3  ;;  %v575_v60 = vld [vmem:[%s1109_s0 + $0x120] sm:$0xff]  ;;  %v578_v61 = vld [vmem:[%s1109_s0 + $0x138] sm:$0xff]  ;;  %v593_v62 = vld [vmem:[%s1109_s0 + $0x170] sm:$0xff] }
  0x16   :  { %83 = vmatpush.msra.mxu0 %v769_v17  ;;  %309 = vmatpush.msrb.mxu1 %v717_v10  ;;  %v594_v63 = vld [vmem:[%s1109_s0 + $0x178] sm:$0xff]  ;;  %v597_v6 = vld [vmem:[%s1109_s0 + $0x190] sm:$0xff] }
  0x17   :  { %195 = vmatpush.msra.mxu2 %v769_v17  ;;  %629 = vmatpush.msra.mxu3 %v687_v5  ;;  %v601_v8 = vld [vmem:[%s1109_s0 + $0x1b0] sm:$0x3] }
  0x18   :  { %562 = vmatmul.msk.f32.gmra.mxu3 %vm47_vm1, %v550_v18  ;;  %84 = vmatpush.msra.mxu0 %v782_v19 }
  0x19   :  { %196 = vmatpush.msra.mxu2 %v782_v19  ;;  %540 = vmatmul.msk.f32.gmra.mxu1 %vm47_vm1, %v38_v20 }
  0x1a   :  { %85 = vmatpush.msra.mxu0 %v794_v21  ;;  %310 = vmatpush.msrb.mxu1 %v727_v11 }
  0x1b   :  { %197 = vmatpush.msra.mxu2 %v794_v21 }
  0x1c   :  { %86 = vmatpush.msra.mxu0 %v803_v22  ;;  %311 = vmatpush.msrb.mxu1 %v739_v13 }
  0x1d   :  { %198 = vmatpush.msra.mxu2 %v803_v22 }
  0x1e   :  { %87 = vmatpush.msra.mxu0 %v812_v23  ;;  %312 = vmatpush.msrb.mxu1 %v751_v15 }
  0x1f   :  { %199 = vmatpush.msra.mxu2 %v812_v23 }
  0x20   :  { %563 = vmatmul.msk.f32.gmra.mxu3 %vm47_vm1, %v552_v24  ;;  %88 = vmatpush.msra.mxu0 %v823_v25 }
  0x21   :  { %200 = vmatpush.msra.mxu2 %v823_v25  ;;  %89 = vmatmul.f32.vlgmr.msra.gmra.mxu0 %v33_v26 }
  0x22   :  { %201 = vmatmul.f32.vlgmr.msra.gmra.mxu2 %v545_v27  ;;  %541 = vmatmul.msk.f32.gmra.mxu1 %vm47_vm1, %v40_v28 }
  0x23   :  { %603 = vmatpush.msk.msrb.mxu2 %vm69_vm0, %v659_v1  ;;  %423 = vmatpush.msrb.mxu0 %v654_v0  ;;  %v580_v1 = vld [vmem:[%s1109_s0 + $0x148] sm:$0x3] }
  0x24   :  { %313 = vmatpush.msrb.mxu1 %v760_v16 }
  0x25   :  { %424 = vmatpush.msrb.mxu0 %v664_v2  ;;  %475 = vmatpush.msrb.mxu2 %v671_v3  ;;  %v596_v3 = vld [vmem:[%s1109_s0 + $0x188] sm:$0xff] }
  0x26   :  { %314 = vmatpush.msrb.mxu1 %v769_v17 }
  0x27   :  { %425 = vmatpush.msrb.mxu0 %v678_v4  ;;  %476 = vmatpush.msrb.mxu2 %v687_v5  ;;  %v602_v5 = vld [vmem:[%s1109_s0 + $0x1b8] sm:$0x3] }
  0x28   :  { %564 = vmatmul.msk.f32.gmra.mxu3 %vm47_vm1, %v554_v29  ;;  %315 = vmatpush.msrb.mxu1 %v782_v19 }
  0x29   :  { %92 = vmatmul.f32.gmra.mxu0 %v35_v30 }
  0x2a   :  { %204 = vmatmul.f32.gmra.mxu2 %v547_v31  ;;  %542 = vmatmul.msk.f32.gmra.mxu1 %vm47_vm1, %v42_v32 }
  0x2b   :  { %426 = vmatpush.msrb.mxu0 %v696_v7  ;;  %316 = vmatpush.msrb.mxu1 %v794_v21 }
  0x2d   :  { %427 = vmatpush.msrb.mxu0 %v708_v9  ;;  %317 = vmatpush.msrb.mxu1 %v803_v22 }
  0x2f   :  { %428 = vmatpush.msrb.mxu0 %v717_v10  ;;  %318 = vmatpush.msrb.mxu1 %v812_v23 }
  0x30   :  { %565 = vmatmul.msk.f32.gmra.mxu3 %vm47_vm1, %v556_v33 }
  0x31   :  { %95 = vmatmul.f32.gmra.mxu0 %v37_v34  ;;  %319 = vmatpush.msrb.mxu1 %v823_v25 }
  0x32   :  { %207 = vmatmul.f32.gmra.mxu2 %v549_v35  ;;  %543 = vmatmul.msk.f32.gmra.mxu1 %vm47_vm1, %v44_v36 }
  0x33   :  { %429 = vmatpush.msrb.mxu0 %v727_v11  ;;  %611 = vmatpush.msra.mxu1 %v654_v0  ;;  %v577_v0 = vld [vmem:[%s1109_s0 + $0x130] sm:$0xff] }
  0x35   :  { %430 = vmatpush.msrb.mxu0 %v739_v13  ;;  %612 = vmatpush.msra.mxu1 %v664_v2  ;;  %v595_v2 = vld [vmem:[%s1109_s0 + $0x180] sm:$0xff] }
  0x37   :  { %431 = vmatpush.msrb.mxu0 %v751_v15  ;;  %613 = vmatpush.msra.mxu1 %v678_v4  ;;  %v579_v4 = vld [vmem:[%s1109_s0 + $0x140] sm:$0x3] }
  0x38   :  { %566 = vmatmul.msk.f32.gmra.mxu3 %vm47_vm1, %v558_v37 }
  0x39   :  { %98 = vmatmul.f32.gmra.mxu0 %v39_v38  ;;  %614 = vmatpush.msra.mxu1 %v696_v7  ;;  %v598_v7 = vld [vmem:[%s1109_s0 + $0x198] sm:$0xff] }
  0x3a   :  { %210 = vmatmul.f32.gmra.mxu2 %v551_v39  ;;  %544 = vmatmul.msk.f32.gmra.mxu1 %vm47_vm1, %v46_v40 }
  0x3b   :  { %432 = vmatpush.msrb.mxu0 %v760_v16  ;;  %615 = vmatpush.msra.mxu1 %v708_v9  ;;  %v599_v9 = vld [vmem:[%s1109_s0 + $0x1a0] sm:$0xff] }
  0x3d   :  { %433 = vmatpush.msrb.mxu0 %v769_v17  ;;  %616 = vmatpush.msra.mxu1 %v717_v10  ;;  %v600_v10 = vld [vmem:[%s1109_s0 + $0x1a8] sm:$0xff] }
  0x3f   :  { %434 = vmatpush.msrb.mxu0 %v782_v19  ;;  %617 = vmatpush.msra.mxu1 %v727_v11 }
  0x40   :  { %582 = vmatmul.msk.f32.vlgmr.msrb.gmra.mxu3 %vm47_vm1, %v568_v41 }
  0x41   :  { %101 = vmatmul.f32.gmra.mxu0 %v41_v42  ;;  %618 = vmatpush.msra.mxu1 %v739_v13 }
  0x42   :  { %213 = vmatmul.f32.gmra.mxu2 %v553_v43  ;;  %320 = vmatmul.f32.vlgmr.msrb.gmra.mxu1 %v567_v44 }
  0x43   :  { %435 = vmatpush.msrb.mxu0 %v794_v21  ;;  %619 = vmatpush.msra.mxu1 %v751_v15 }
  0x45   :  { %436 = vmatpush.msrb.mxu0 %v803_v22  ;;  %620 = vmatpush.msra.mxu1 %v760_v16 }
  0x47   :  { %437 = vmatpush.msrb.mxu0 %v812_v23  ;;  %621 = vmatpush.msra.mxu1 %v769_v17 }
  0x48   :  { %583 = vmatmul.msk.f32.gmra.mxu3 %vm47_vm1, %v570_v45 }
  0x49   :  { %104 = vmatmul.f32.gmra.mxu0 %v43_v46  ;;  %622 = vmatpush.msra.mxu1 %v782_v19 }
  0x4a   :  { %216 = vmatmul.f32.gmra.mxu2 %v555_v47  ;;  %323 = vmatmul.f32.gmra.mxu1 %v569_v48 }
  0x4b   :  { %438 = vmatpush.msrb.mxu0 %v823_v25  ;;  %623 = vmatpush.msra.mxu1 %v794_v21 }
  0x4d   :  { %624 = vmatpush.msra.mxu1 %v803_v22 }
  0x4f   :  { %625 = vmatpush.msra.mxu1 %v812_v23 }
  0x50   :  { %584 = vmatmul.msk.f32.gmra.mxu3 %vm47_vm1, %v572_v49 }
  0x51   :  { %107 = vmatmul.f32.gmra.mxu0 %v45_v50  ;;  %626 = vmatpush.msra.mxu1 %v823_v25 }
  0x52   :  { %219 = vmatmul.f32.gmra.mxu2 %v557_v51  ;;  %326 = vmatmul.f32.gmra.mxu1 %v571_v52 }
  0x58   :  { %585 = vmatmul.msk.f32.gmra.mxu3 %vm47_vm1, %v574_v53 }
  0x59   :  { %439 = vmatmul.f32.vlgmr.msrb.gmra.mxu0 %v589_v54 }
  0x5a   :  { %604 = vmatmul.msk.f32.vlgmr.msrb.gmra.mxu2 %vm47_vm1, %v590_v55  ;;  %329 = vmatmul.f32.gmra.mxu1 %v573_v56 }
  0x60   :  { %586 = vmatmul.msk.f32.gmra.mxu3 %vm47_vm1, %v576_v57 }
  0x61   :  { %442 = vmatmul.f32.gmra.mxu0 %v591_v58 }
  0x62   :  { %605 = vmatmul.msk.f32.gmra.mxu2 %vm47_vm1, %v592_v59  ;;  %332 = vmatmul.f32.gmra.mxu1 %v575_v60 }
  0x68   :  { %587 = vmatmul.msk.f32.gmra.mxu3 %vm47_vm1, %v578_v61 }
  0x69   :  { %445 = vmatmul.f32.gmra.mxu0 %v593_v62 }
  0x6a   :  { %606 = vmatmul.msk.f32.gmra.mxu2 %vm47_vm1, %v594_v63  ;;  %335 = vmatmul.f32.gmra.mxu1 %v577_v0 }
  0x70   :  { %588 = vmatmul.msk.f32.gmra.mxu3 %vm47_vm1, %v580_v1 }
  0x71   :  { %448 = vmatmul.f32.gmra.mxu0 %v595_v2 }
  0x72   :  { %607 = vmatmul.msk.f32.gmra.mxu2 %vm47_vm1, %v596_v3  ;;  %338 = vmatmul.f32.gmra.mxu1 %v579_v4 }
  0x78   :  { %610 = vmatmul.msk.f32.vlgmr.msra.gmra.mxu3 %vm47_vm1, %v602_v5 }
  0x79   :  { %451 = vmatmul.f32.gmra.mxu0 %v597_v6  ;;  %v1064_v6 = vld [vmem:[%s1110_s2] ss:$0 sm:$0xff] }
  0x7a   :  { %608 = vmatmul.msk.f32.gmra.mxu2 %vm47_vm1, %v598_v7  ;;  %457 = vmatmul.f32.vlgmr.msra.gmra.mxu1 %v601_v8 }
  0x81   :  { %454 = vmatmul.f32.gmra.mxu0 %v599_v9 }
  0x82   :  { %609 = vmatmul.msk.f32.gmra.mxu2 %vm47_vm1, %v600_v10 }
  0x86   :  { %v128_v11 = vpop.f32.mrf.mxu1 }
  0x8b   :  { %v240_v12 = vpop.f32.mrf.mxu3 }
  0x8e   :  { %v131_v13 = vpop.f32.mrf.mxu1 }
  0x93   :  { %v243_v14 = vpop.f32.mrf.mxu3 }
  0x96   :  { %v134_v15 = vpop.f32.mrf.mxu1 }
  0x9b   :  { %v246_v16 = vpop.f32.mrf.mxu3 }
  0x9e   :  { %v90_v17 = vpop.f32.mrf.mxu0 }
  0x9f   :  { %v137_v18 = vpop.f32.mrf.mxu1  ;;  %v129_v21 = vadd.f32 %v128_v11, %v90_v17 }
  0xa3   :  { %v249_v19 = vpop.f32.mrf.mxu3 }
  0xa5   :  { %v202_v20 = vpop.f32.mrf.mxu2 }
  0xa6   :  { %v241_v22 = vadd.f32 %v240_v12, %v202_v20  ;;  %v93_v23 = vpop.f32.mrf.mxu0 }
  0xa7   :  { %v140_v24 = vpop.f32.mrf.mxu1  ;;  %v132_v28 = vadd.f32 %v131_v13, %v93_v23 }
  0xa8   :  { %v261_v25 = vmax.f32 %v129_v21, %v241_v22 }
  0xab   :  { %v252_v26 = vpop.f32.mrf.mxu3 }
  0xad   :  { %v205_v27 = vpop.f32.mrf.mxu2 }
  0xae   :  { %v244_v29 = vadd.f32 %v243_v14, %v205_v27  ;;  %v96_v30 = vpop.f32.mrf.mxu0 }
  0xaf   :  { %v143_v31 = vpop.f32.mrf.mxu1  ;;  %v135_v35 = vadd.f32 %v134_v15, %v96_v30 }
  0xb0   :  { %v262_v32 = vmax.f32 %v132_v28, %v244_v29 }
  0xb3   :  { %v255_v33 = vpop.f32.mrf.mxu3 }
  0xb5   :  { %v208_v34 = vpop.f32.mrf.mxu2 }
  0xb6   :  { %v247_v36 = vadd.f32 %v246_v16, %v208_v34  ;;  %v99_v37 = vpop.f32.mrf.mxu0 }
  0xb7   :  { %v1042_v38 = vpop.f32.mrf.mxu1  ;;  %v1046_v42 = vadd.f32 %v137_v18, %v99_v37 }
  0xb8   :  { %v263_v39 = vmax.f32 %v135_v35, %v247_v36 }
  0xbb   :  { %v1044_v40 = vpop.f32.mrf.mxu3 }
  0xbd   :  { %v211_v41 = vpop.f32.mrf.mxu2 }
  0xbe   :  { %v250_v43 = vadd.f32 %v249_v19, %v211_v41  ;;  %v102_v44 = vpop.f32.mrf.mxu0 }
  0xbf   :  { %v321_v45 = vpop.f32.mrf.mxu1  ;;  %v1049_v49 = vadd.f32 %v140_v24, %v102_v44 }
  0xc0   :  { %v264_v46 = vmax.f32 %v1046_v42, %v250_v43 }
  0xc3   :  { %v359_v47 = vpop.f32.mrf.mxu3 }
  0xc4   :  { %v360_v1 = vadd.f32 %v359_v47, %v321_v45 }
  0xc5   :  { %v214_v48 = vpop.f32.mrf.mxu2 }
  0xc6   :  { %v1051_v50 = vadd.f32 %v252_v26, %v214_v48  ;;  %v105_v51 = vpop.f32.mrf.mxu0  ;;  %v380_v4 = vmax.f32 %v261_v25, %v360_v1 }
  0xc7   :  { %v324_v52 = vpop.f32.mrf.mxu1  ;;  %v1055_v56 = vadd.f32 %v143_v31, %v105_v51 }
  0xc8   :  { %v265_v53 = vmax.f32 %v1049_v49, %v1051_v50 }
  0xcb   :  { %v362_v54 = vpop.f32.mrf.mxu3 }
  0xcc   :  { %v363_v10 = vadd.f32 %v362_v54, %v324_v52 }
  0xcd   :  { %v217_v55 = vpop.f32.mrf.mxu2 }
  0xce   :  { %v1057_v57 = vadd.f32 %v255_v33, %v217_v55  ;;  %v108_v58 = vpop.f32.mrf.mxu0  ;;  %v381_v15 = vmax.f32 %v262_v32, %v363_v10 }
  0xcf   :  { %v327_v59 = vpop.f32.mrf.mxu1 }
  0xd0   :  { %v266_v60 = vmax.f32 %v1055_v56, %v1057_v57 }
  0xd3   :  { %v365_v61 = vpop.f32.mrf.mxu3 }
  0xd4   :  { %v366_v20 = vadd.f32 %v365_v61, %v327_v59 }
  0xd5   :  { %v220_v62 = vpop.f32.mrf.mxu2 }
  0xd6   :  { %v440_v63 = vpop.f32.mrf.mxu0  ;;  %v382_v25 = vmax.f32 %v263_v39, %v366_v20  ;;  %v259_v35 = vadd.f32 %v1044_v40, %v220_v62  ;;  %v147_v39 = vadd.f32 %v1042_v38, %v108_v58 }
  0xd7   :  { %v330_v0 = vpop.f32.mrf.mxu1 }
  0xd8   :  { %v267_v45 = vmax.f32 %v147_v39, %v259_v35 }
  0xdb   :  { %v368_v2 = vpop.f32.mrf.mxu3 }
  0xdc   :  { %v369_v30 = vadd.f32 %v368_v2, %v330_v0 }
  0xdd   :  { %v478_v3 = vpop.f32.mrf.mxu2 }
  0xde   :  { %v479_v5 = vadd.f32 %v478_v3, %v440_v63  ;;  %v443_v7 = vpop.f32.mrf.mxu0  ;;  %v383_v36 = vmax.f32 %v264_v46, %v369_v30 }
  0xdf   :  { %v333_v8 = vpop.f32.mrf.mxu1 }
  0xe0   :  { %v499_v9 = vmax.f32 %v380_v4, %v479_v5 }
  0xe2   :  { %v510_v11 = vadd.f32 %v1064_v6, %v499_v9 }
  0xe3   :  { %v371_v12 = vpop.f32.mrf.mxu3 }
  0xe4   :  { %v517_v13 = vmax.f32 %v510_v11, 0.0  ;;  %v372_v47 = vadd.f32 %v371_v12, %v333_v8 }
  0xe5   :  { %v481_v14 = vpop.f32.mrf.mxu2 }
  0xe6   :  { %525 = vst.msk [vmem:[%s1111_s3] sm:$0xff] %vm524_vm2, %v517_v13  ;;  %v482_v16 = vadd.f32 %v481_v14, %v443_v7  ;;  %v446_v17 = vpop.f32.mrf.mxu0  ;;  %v384_v55 = vmax.f32 %v265_v53, %v372_v47 }
  0xe7   :  { %v336_v18 = vpop.f32.mrf.mxu1 }
  0xe8   :  { %v500_v19 = vmax.f32 %v381_v15, %v482_v16 }
  0xea   :  { %v511_v21 = vadd.f32 %v1064_v6, %v500_v19 }
  0xeb   :  { %v374_v22 = vpop.f32.mrf.mxu3 }
  0xec   :  { %v518_v23 = vmax.f32 %v511_v21, 0.0  ;;  %v375_v62 = vadd.f32 %v374_v22, %v336_v18 }
  0xed   :  { %v484_v24 = vpop.f32.mrf.mxu2 }
  0xee   :  { %526 = vst.msk [vmem:[%s1111_s3 + $0x8] sm:$0xff] %vm524_vm2, %v518_v23  ;;  %v485_v26 = vadd.f32 %v484_v24, %v446_v17  ;;  %v449_v28 = vpop.f32.mrf.mxu0  ;;  %v385_v53 = vmax.f32 %v266_v60, %v375_v62 }
  0xef   :  { %v339_v27 = vpop.f32.mrf.mxu1 }
  0xf0   :  { %v501_v29 = vmax.f32 %v382_v25, %v485_v26 }
  0xf2   :  { %v512_v31 = vadd.f32 %v1064_v6, %v501_v29 }
  0xf3   :  { %v377_v32 = vpop.f32.mrf.mxu3 }
  0xf4   :  { %v519_v33 = vmax.f32 %v512_v31, 0.0  ;;  %v378_v41 = vadd.f32 %v377_v32, %v339_v27 }
  0xf5   :  { %v487_v34 = vpop.f32.mrf.mxu2 }
  0xf6   :  { %527 = vst.msk [vmem:[%s1111_s3 + $0x10] sm:$0xff] %vm524_vm2, %v519_v33  ;;  %v488_v37 = vadd.f32 %v487_v34, %v449_v28  ;;  %v452_v44 = vpop.f32.mrf.mxu0  ;;  %v386_v52 = vmax.f32 %v267_v45, %v378_v41 }
  0xf7   :  { %v458_v43 = vpop.f32.mrf.mxu1 }
  0xf8   :  { %v502_v42 = vmax.f32 %v383_v36, %v488_v37 }
  0xfa   :  { %v513_v48 = vadd.f32 %v1064_v6, %v502_v42 }
  0xfb   :  { %v496_v51 = vpop.f32.mrf.mxu3 }
  0xfc   :  { %v520_v40 = vmax.f32 %v513_v48, 0.0  ;;  %v497_v46 = vadd.f32 %v496_v51, %v458_v43 }
  0xfd   :  { %v490_v54 = vpop.f32.mrf.mxu2 }
  0xfe   :  { %528 = vst.msk [vmem:[%s1111_s3 + $0x18] sm:$0xff] %vm524_vm2, %v520_v40  ;;  %v505_v38 = vmax.f32 %v386_v52, %v497_v46  ;;  %v491_v58 = vadd.f32 %v490_v54, %v452_v44  ;;  %v455_v1 = vpop.f32.mrf.mxu0 }
 0x100   :  { %v516_v59 = vadd.f32 %v1064_v6, %v505_v38  ;;  %v503_v61 = vmax.f32 %v384_v55, %v491_v58 }
 0x102   :  { %v523_v63 = vmax.f32 %v516_v59, 0.0  ;;  %v514_v0 = vadd.f32 %v1064_v6, %v503_v61 }
 0x104   :  { %532 = vst.msk [vmem:[%s1111_s3 + $0x30] sm:$0x3] %vm531_vm3, %v523_v63  ;;  %v521_v49 = vmax.f32 %v514_v0, 0.0 }
 0x105   :  { %v493_v50 = vpop.f32.mrf.mxu2 }
 0x106   :  { %529 = vst.msk [vmem:[%s1111_s3 + $0x20] sm:$0xff] %vm524_vm2, %v521_v49  ;;  %v494_v2 = vadd.f32 %v493_v50, %v455_v1 }
 0x108   :  { %v504_v3 = vmax.f32 %v385_v53, %v494_v2 }
 0x10a   :  { %v515_v4 = vadd.f32 %v1064_v6, %v504_v3 }
 0x10c   :  { %v522_v5 = vmax.f32 %v515_v4, 0.0 }
 0x10e   :  { %530 = vst.msk [vmem:[%s1111_s3 + $0x28] sm:$0xff] %vm524_vm2, %v522_v5 }

// kernel: forward.5
= control target key start
LH: loop header
LB: loop body
LE: loop exit
PB: predicated region body
PF: predicated region fallthrough
CT: control target
= control target key end

     0   :  { %s745_s0 = inlined_call_operand.vmem [shape: f32[2,400], index: 0, kind: input, shape index: {}]   ;;  %s746_s1 = inlined_call_operand.vmem [shape: f32[400,120], index: 1, kind: input, shape index: {}]   ;;  %s747_s2 = inlined_call_operand.vmem [shape: f32[1,120], index: 2, kind: input, shape index: {}]   ;;  %s748_s3 = inlined_call_operand.vmem [shape: f32[120,84], index: 3, kind: input, shape index: {}]   ;;  %s749_s4 = inlined_call_operand.vmem [shape: f32[1,84], index: 4, kind: input, shape index: {}]   ;;  %s750_s5 = inlined_call_operand.vmem [shape: f32[84,42], index: 5, kind: input, shape index: {}]   ;;  %s751_s6 = inlined_call_operand.vmem [shape: f32[1,42], index: 6, kind: input, shape index: {}]   ;;  %s752_s7 = inlined_call_operand.vmem [shape: f32[42,21], index: 7, kind: input, shape index: {}]   ;;  %s753_s8 = inlined_call_operand.vmem [shape: f32[1,21], index: 8, kind: input, shape index: {}]   ;;  %s754_s9 = inlined_call_operand.vmem [shape: f32[21,10], index: 9, kind: input, shape index: {}]   ;;  %s755_s10 = inlined_call_operand.vmem [shape: f32[1,10], index: 10, kind: input, shape index: {}]   ;;  %s756_s11 = inlined_call_operand.hbm [shape: f32[2,10], index: 11, kind: output, shape index: {}]  }
   0x1   :  { %v87_v0 = vld [vmem:[%s746_s1 + $0x178] sm:$0xff]  ;;  %v86_v2 = vld [vmem:[%s746_s1 + $0x170] sm:$0xff]  ;;  %v85_v5 = vld [vmem:[%s746_s1 + $0x168] sm:$0xff] }
   0x2   :  { %v55_v1 = vld [vmem:[%s746_s1 + $0x78] sm:$0xff]  ;;  %146 = vmatpush.msra.mxu2 %v87_v0  ;;  %v54_v3 = vld [vmem:[%s746_s1 + $0x70] sm:$0xff]  ;;  %v53_v6 = vld [vmem:[%s746_s1 + $0x68] sm:$0xff] }
   0x3   :  { %106 = vmatpush.msra.mxu0 %v55_v1  ;;  %v71_v4 = vld [vmem:[%s746_s1 + $0xf8] sm:$0xff]  ;;  %v70_v7 = vld [vmem:[%s746_s1 + $0xf0] sm:$0xff]  ;;  %v69_v8 = vld [vmem:[%s746_s1 + $0xe8] sm:$0xff] }
   0x4   :  { %126 = vmatpush.msra.mxu1 %v71_v4  ;;  %147 = vmatpush.msra.mxu2 %v86_v2  ;;  %v84_v9 = vld [vmem:[%s746_s1 + $0x160] sm:$0xff]  ;;  %v83_v12 = vld [vmem:[%s746_s1 + $0x158] sm:$0xff]  ;;  %v82_v15 = vld [vmem:[%s746_s1 + $0x150] sm:$0xff] }
   0x5   :  { %107 = vmatpush.msra.mxu0 %v54_v3  ;;  %v52_v10 = vld [vmem:[%s746_s1 + $0x60] sm:$0xff]  ;;  %v51_v13 = vld [vmem:[%s746_s1 + $0x58] sm:$0xff]  ;;  %v50_v16 = vld [vmem:[%s746_s1 + $0x50] sm:$0xff] }
   0x6   :  { %127 = vmatpush.msra.mxu1 %v70_v7  ;;  %148 = vmatpush.msra.mxu2 %v85_v5  ;;  %v68_v11 = vld [vmem:[%s746_s1 + $0xe0] sm:$0xff]  ;;  %v67_v14 = vld [vmem:[%s746_s1 + $0xd8] sm:$0xff]  ;;  %v66_v17 = vld [vmem:[%s746_s1 + $0xd0] sm:$0xff] }
   0x7   :  { %108 = vmatpush.msra.mxu0 %v53_v6  ;;  %v81_v18 = vld [vmem:[%s746_s1 + $0x148] sm:$0xff]  ;;  %v80_v21 = vld [vmem:[%s746_s1 + $0x140] sm:$0xff]  ;;  %v79_v24 = vld [vmem:[%s746_s1 + $0x138] sm:$0xff] }
   0x8   :  { %128 = vmatpush.msra.mxu1 %v69_v8  ;;  %149 = vmatpush.msra.mxu2 %v84_v9  ;;  %v49_v19 = vld [vmem:[%s746_s1 + $0x48] sm:$0xff]  ;;  %v48_v22 = vld [vmem:[%s746_s1 + $0x40] sm:$0xff]  ;;  %v47_v25 = vld [vmem:[%s746_s1 + $0x38] sm:$0xff] }
   0x9   :  { %109 = vmatpush.msra.mxu0 %v52_v10  ;;  %v65_v20 = vld [vmem:[%s746_s1 + $0xc8] sm:$0xff]  ;;  %v64_v23 = vld [vmem:[%s746_s1 + $0xc0] sm:$0xff]  ;;  %v63_v26 = vld [vmem:[%s746_s1 + $0xb8] sm:$0xff] }
   0xa   :  { %129 = vmatpush.msra.mxu1 %v68_v11  ;;  %150 = vmatpush.msra.mxu2 %v83_v12  ;;  %v89_v27 = vld [vmem:[%s746_s1 + $0x188] sm:$0xff]  ;;  %v39_v28 = vld [vmem:[%s745_s0] sm:$0xff]  ;;  %v78_v29 = vld [vmem:[%s746_s1 + $0x130] sm:$0xff] }
   0xb   :  { %110 = vmatpush.msra.mxu0 %v51_v13  ;;  %v46_v30 = vld [vmem:[%s746_s1 + $0x30] sm:$0xff]  ;;  %180 = vmatpush.msra.mxu3 %v89_v27  ;;  %95 = vst [vmem:[#allocation1] ss:$4 sm:$0xff] %v39_v28  ;;  %v88_v31 = vld [vmem:[%s746_s1 + $0x180] sm:$0xff]  ;;  %v77_v32 = vld [vmem:[%s746_s1 + $0x128] sm:$0xff] }
   0xc   :  { %130 = vmatpush.msra.mxu1 %v67_v14  ;;  %151 = vmatpush.msra.mxu2 %v82_v15  ;;  %v62_v33 = vld [vmem:[%s746_s1 + $0xb0] sm:$0xff]  ;;  %v45_v35 = vld [vmem:[%s746_s1 + $0x28] sm:$0xff]  ;;  %v76_v36 = vld [vmem:[%s746_s1 + $0x120] sm:$0xff] }
   0xd   :  { %111 = vmatpush.msra.mxu0 %v50_v16  ;;  %v201_v34 = vld [vmem:[%s748_s3 + $0x70] sm:$0xff]  ;;  %v44_v37 = vld [vmem:[%s746_s1 + $0x20] sm:$0xff]  ;;  %181 = vmatpush.msra.mxu3 %v88_v31  ;;  %v61_v38 = vld [vmem:[%s746_s1 + $0xa8] sm:$0xff] }
   0xe   :  { %131 = vmatpush.msra.mxu1 %v66_v17  ;;  %152 = vmatpush.msra.mxu2 %v81_v18  ;;  %v60_v39 = vld [vmem:[%s746_s1 + $0xa0] sm:$0xff]  ;;  %v200_v40 = vld [vmem:[%s748_s3 + $0x68] sm:$0xff]  ;;  %v75_v42 = vld [vmem:[%s746_s1 + $0x118] sm:$0xff] }
   0xf   :  { %112 = vmatpush.msra.mxu0 %v49_v19  ;;  %211 = vmatpush.msrb.mxu3 %v201_v34  ;;  %v199_v41 = vld [vmem:[%s748_s3 + $0x60] sm:$0xff]  ;;  %v43_v43 = vld [vmem:[%s746_s1 + $0x18] sm:$0xff] }
  0x10   :  { %132 = vmatpush.msra.mxu1 %v65_v20  ;;  %153 = vmatpush.msra.mxu2 %v80_v21 }
  0x11   :  { %113 = vmatpush.msra.mxu0 %v48_v22  ;;  %212 = vmatpush.msrb.mxu3 %v200_v40 }
  0x12   :  { %133 = vmatpush.msra.mxu1 %v64_v23  ;;  %154 = vmatpush.msra.mxu2 %v79_v24 }
  0x13   :  { %114 = vmatpush.msra.mxu0 %v47_v25 }
  0x14   :  { %134 = vmatpush.msra.mxu1 %v63_v26  ;;  %155 = vmatpush.msra.mxu2 %v78_v29 }
  0x15   :  { %115 = vmatpush.msra.mxu0 %v46_v30 }
  0x16   :  { %135 = vmatpush.msra.mxu1 %v62_v33  ;;  %156 = vmatpush.msra.mxu2 %v77_v32 }
  0x17   :  { %116 = vmatpush.msra.mxu0 %v45_v35 }
  0x18   :  { %136 = vmatpush.msra.mxu1 %v61_v38 }
  0x19   :  { %16 = vsyncpa [#allocation3], 0  ;;  %157 = vmatpush.msra.mxu2 %v76_v36  ;;  %117 = vmatpush.msra.mxu0 %v44_v37  ;;  %v59_v44 = vld [vmem:[%s746_s1 + $0x98] sm:$0xff]  ;;  %vm103_vm0 = vcmask 130048   ;;  %v74_v45 = vld [vmem:[%s746_s1 + $0x110] sm:$0xff]  ;;  %vm250_vm1 = vcmask 1043456  }
  0x1a   :  { %137 = vmatpush.msra.mxu1 %v60_v39  ;;  %v42_v46 = vld [vmem:[%s746_s1 + $0x10] sm:$0xff]  ;;  %v99_v47 = vld.sshfl [vmem:[#allocation1 + $0x18] sm:$0xff pattern:$0x73625140]  ;;  %213 = vmatpush.msrb.mxu3 %v199_v41  ;;  %v73_v50 = vld [vmem:[%s746_s1 + $0x108] sm:$0xff]  ;;  %vm206_vm2 = vcmask 982016  }
  0x1b   :  { %158 = vmatpush.msra.mxu2 %v75_v42  ;;  %118 = vmatpush.msra.mxu0 %v43_v43  ;;  %v58_v48 = vld [vmem:[%s746_s1 + $0x90] sm:$0xff]  ;;  %v198_v49 = vld [vmem:[%s748_s3 + $0x58] sm:$0xff]  ;;  %v41_v51 = vld [vmem:[%s746_s1 + $0x8] sm:$0xff]  ;;  %vm289_vm3 = vcmask 1041408   ;;  %vm246_vm4 = vcmask 687104   ;;  %vm325_vm5 = vcmask 1044480  }
  0x1c   :  { %138 = vmatpush.msra.mxu1 %v59_v44  ;;  %368 = vmatmul.msk.f32.vlgmr.msra.gmra.mxu3 %vm103_vm0, %v99_v47  ;;  %v57_v52 = vld [vmem:[%s746_s1 + $0x88] sm:$0xff]  ;;  %v197_v53 = vld [vmem:[%s748_s3 + $0x50] sm:$0xff]  ;;  %v72_v54 = vld [vmem:[%s746_s1 + $0x100] sm:$0xff]  ;;  %vm285_vm6 = vcmask 343040   ;;  %vm321_vm7 = vcmask 171008   ;;  %s408_s30 = smov [#allocation2]  }
  0x1d   :  { %159 = vmatpush.msra.mxu2 %v74_v45  ;;  %119 = vmatpush.msra.mxu0 %v42_v46  ;;  %v40_v55 = vld [vmem:[%s746_s1] sm:$0xff]  ;;  %v98_v56 = vld.sshfl [vmem:[#allocation1 + $0x10] sm:$0xff pattern:$0x73625140]  ;;  %v196_v59 = vld [vmem:[%s748_s3 + $0x48] sm:$0xff]  ;;  %s357_s12 = sshll.u32 %s408_s30, 4  ;;  %s358_s12 = int_to_ptr.vmem [resolvable:$true] %s357_s12 }
  0x1e   :  { %139 = vmatpush.msra.mxu1 %v58_v48  ;;  %214 = vmatpush.msrb.mxu3 %v198_v49  ;;  %v96_v57 = vld.sshfl [vmem:[#allocation1] sm:$0xff pattern:$0x73625140]  ;;  %v97_v60 = vld.sshfl [vmem:[#allocation1 + $0x8] sm:$0xff pattern:$0x73625140] }
  0x1f   :  { %160 = vmatpush.msra.mxu2 %v73_v50  ;;  %120 = vmatpush.msra.mxu0 %v41_v51  ;;  %v56_v58 = vld [vmem:[%s746_s1 + $0x80] sm:$0xff]  ;;  %v194_v62 = vld [vmem:[%s748_s3 + $0x38] sm:$0xff]  ;;  %v193_v63 = vld [vmem:[%s748_s3 + $0x30] sm:$0xff]  ;;  %vm350_vm8 = vcmask 74752  }
  0x20   :  { %140 = vmatpush.msra.mxu1 %v57_v52  ;;  %215 = vmatpush.msrb.mxu3 %v197_v53  ;;  %v195_v61 = vld [vmem:[%s748_s3 + $0x40] sm:$0xff]  ;;  %v192_v0 = vld [vmem:[%s748_s3 + $0x28] sm:$0xff]  ;;  %v190_v2 = vld [vmem:[%s748_s3 + $0x18] sm:$0xff] }
  0x21   :  { %161 = vmatpush.msra.mxu2 %v72_v54  ;;  %121 = vmatpush.msra.mxu0 %v40_v55  ;;  %v191_v1 = vld [vmem:[%s748_s3 + $0x20] sm:$0xff]  ;;  %v189_v3 = vld [vmem:[%s748_s3 + $0x10] sm:$0xff]  ;;  %v188_v4 = vld [vmem:[%s748_s3 + $0x8] sm:$0xff] }
  0x22   :  { %162 = vmatmul.f32.vlgmr.msra.gmra.mxu2 %v98_v56  ;;  %122 = vmatmul.f32.vlgmr.msra.gmra.mxu0 %v96_v57  ;;  %v187_v5 = vld [vmem:[%s748_s3] sm:$0xff]  ;;  %v241_v6 = vld [vmem:[%s750_s5 + $0x50] sm:$0xf]  ;;  %v240_v7 = vld [vmem:[%s750_s5 + $0x48] sm:$0xff] }
  0x23   :  { %141 = vmatpush.msra.mxu1 %v56_v58  ;;  %216 = vmatpush.msrb.mxu3 %v196_v59  ;;  %v239_v8 = vld [vmem:[%s750_s5 + $0x40] sm:$0xff]  ;;  %v238_v9 = vld [vmem:[%s750_s5 + $0x38] sm:$0xff]  ;;  %v237_v10 = vld [vmem:[%s750_s5 + $0x30] sm:$0xff] }
  0x24   :  { %142 = vmatmul.f32.vlgmr.msra.gmra.mxu1 %v97_v60  ;;  %370 = vmatpush.msk.msrb.mxu0 %vm250_vm1, %v241_v6  ;;  %v236_v11 = vld [vmem:[%s750_s5 + $0x28] sm:$0xff]  ;;  %v235_v12 = vld [vmem:[%s750_s5 + $0x20] sm:$0xff]  ;;  %v234_v13 = vld [vmem:[%s750_s5 + $0x18] sm:$0xff] }
  0x25   :  { %217 = vmatpush.msrb.mxu3 %v195_v61  ;;  %v377_v14 = vld [vmem:[%s747_s2] ss:$0 sm:$0xff]  ;;  %v233_v24 = vld [vmem:[%s750_s5 + $0x10] sm:$0xff]  ;;  %v232_v25 = vld [vmem:[%s750_s5 + $0x8] sm:$0xff] }
  0x26   :  { %260 = vmatpush.msrb.mxu0 %v240_v7  ;;  %v231_v26 = vld [vmem:[%s750_s5] sm:$0xff]  ;;  %v280_v27 = vld [vmem:[%s752_s7 + $0x28] sm:$0x3]  ;;  %v278_v29 = vld [vmem:[%s752_s7 + $0x18] sm:$0xff] }
  0x27   :  { %218 = vmatpush.msrb.mxu3 %v194_v62  ;;  %v279_v28 = vld [vmem:[%s752_s7 + $0x20] sm:$0xff]  ;;  %372 = vmatpush.msk.msrb.mxu1 %vm289_vm3, %v280_v27  ;;  %v277_v34 = vld [vmem:[%s752_s7 + $0x10] sm:$0xff]  ;;  %v276_v35 = vld [vmem:[%s752_s7 + $0x8] sm:$0xff] }
  0x28   :  { %261 = vmatpush.msrb.mxu0 %v239_v8  ;;  %v378_v30 = vld [vmem:[%s749_s4] ss:$0 sm:$0xff]  ;;  %v316_v37 = vld [vmem:[%s754_s9 + $0x10] sm:$0x1f]  ;;  %v315_v42 = vld [vmem:[%s754_s9 + $0x8] sm:$0xff] }
  0x29   :  { %219 = vmatpush.msrb.mxu3 %v193_v63  ;;  %304 = vmatpush.msrb.mxu1 %v279_v28  ;;  %v275_v36 = vld [vmem:[%s752_s7] sm:$0xff] }
  0x2a   :  { %262 = vmatpush.msrb.mxu0 %v238_v9  ;;  %374 = vmatpush.msk.msrb.mxu2 %vm325_vm5, %v316_v37  ;;  %v379_v38 = vld [vmem:[%s751_s6] ss:$0 sm:$0xff] }
  0x2b   :  { %220 = vmatpush.msrb.mxu3 %v192_v0  ;;  %305 = vmatpush.msrb.mxu1 %v278_v29  ;;  %v314_v43 = vld [vmem:[%s754_s9] sm:$0xff]  ;;  %s359_s9 = sshll.u32 %s756_s11, 4  ;;  %s360_s9 = int_to_ptr.hbm [resolvable:$true] %s359_s9 }
  0x2c   :  { %263 = vmatpush.msrb.mxu0 %v237_v10  ;;  %343 = vmatpush.msrb.mxu2 %v315_v42  ;;  %v380_v44 = vld [vmem:[%s753_s8] ss:$0 sm:$0xff] }
  0x2d   :  { %221 = vmatpush.msrb.mxu3 %v191_v1  ;;  %306 = vmatpush.msrb.mxu1 %v277_v34  ;;  %v381_v48 = vld [vmem:[%s755_s10] ss:$0 sm:$0xff] }
  0x2e   :  { %264 = vmatpush.msrb.mxu0 %v236_v11  ;;  %344 = vmatpush.msrb.mxu2 %v314_v43 }
  0x2f   :  { %222 = vmatpush.msrb.mxu3 %v190_v2  ;;  %307 = vmatpush.msrb.mxu1 %v276_v35 }
  0x30   :  { %265 = vmatpush.msrb.mxu0 %v235_v12 }
  0x31   :  { %223 = vmatpush.msrb.mxu3 %v189_v3  ;;  %308 = vmatpush.msrb.mxu1 %v275_v36 }
  0x32   :  { %266 = vmatpush.msrb.mxu0 %v234_v13 }
  0x33   :  { %224 = vmatpush.msrb.mxu3 %v188_v4 }
  0x34   :  { %267 = vmatpush.msrb.mxu0 %v233_v24 }
  0x35   :  { %225 = vmatpush.msrb.mxu3 %v187_v5 }
  0x36   :  { %268 = vmatpush.msrb.mxu0 %v232_v25 }
  0x38   :  { %269 = vmatpush.msrb.mxu0 %v231_v26 }
  0x9f   :  { %v123_v15 = vpop.f32.mrf.mxu0  ;;  %v183_v20 = vpop.f32.mrf.mxu3 }
  0xa0   :  { %v124_v16 = vadd.f32 %v377_v14, %v123_v15 }
  0xa1   :  { %v143_v17 = vpop.f32.mrf.mxu1 }
  0xa2   :  { %v144_v18 = vadd.f32 %v143_v17, %v124_v16 }
  0xa5   :  { %v163_v19 = vpop.f32.mrf.mxu2 }
  0xa6   :  { %v164_v21 = vadd.f32 %v163_v19, %v144_v18 }
  0xa8   :  { %v184_v22 = vadd.f32 %v183_v20, %v164_v21 }
  0xaa   :  { %v186_v23 = vmax.f32 %v184_v22, 0.0 }
  0xac   :  { %369 = vmatmul.msk.f32.vlgmr.msrb.gmra.mxu3 %vm206_vm2, %v186_v23 }
 0x12f   :  { %v227_v31 = vpop.f32.mrf.mxu3 }
 0x130   :  { %v228_v32 = vadd.f32 %v378_v30, %v227_v31 }
 0x132   :  { %v230_v33 = vmax.f32 %v228_v32, 0.0 }
 0x134   :  { %371 = vmatmul.msk.f32.vlgmr.msrb.gmra.mxu0 %vm246_vm4, %v230_v33 }
 0x1b1   :  { %v271_v39 = vpop.f32.mrf.mxu0 }
 0x1b2   :  { %v272_v40 = vadd.f32 %v379_v38, %v271_v39 }
 0x1b4   :  { %v274_v41 = vmax.f32 %v272_v40, 0.0 }
 0x1b6   :  { %373 = vmatmul.msk.f32.vlgmr.msrb.gmra.mxu1 %vm285_vm6, %v274_v41 }
 0x233   :  { %v310_v45 = vpop.f32.mrf.mxu1 }
 0x234   :  { %v311_v46 = vadd.f32 %v380_v44, %v310_v45 }
 0x236   :  { %v313_v47 = vmax.f32 %v311_v46, 0.0 }
 0x238   :  { %375 = vmatmul.msk.f32.vlgmr.msrb.gmra.mxu2 %vm321_vm7, %v313_v47 }
 0x2bb   :  { %v346_v49 = vpop.f32.mrf.mxu2 }
 0x2bc   :  { %v347_v50 = vadd.f32 %v381_v48, %v346_v49 }
 0x2be   :  { %v349_v51 = vmax.f32 %v347_v50, 0.0 }
 0x2c0   :  { %351 = vst.msk [vmem:[#allocation2] sm:$0x3] %vm350_vm8, %v349_v51 }
 0x2c1   :  { %362 = dma.vmem_to_hbm [thread:$0]  %s358_s12, 32, %s360_s9, [#allocation3]  }
 0x2c2   :  { %406 = dma.done.wait [#allocation3], 32  }
 0x2c3   :  { %407 = vsyncadd [#allocation3], 4294967264 }
 0x2c4   :  { %367 = vsyncpa [#allocation3], 1 }

</bundles_post_ra>
